<compile_context>
chip_gen: v7x
topology: tpu7x:2x2x1
jax: 0.10.0
libtpu: 0.0.40
codegen_flags: <defaults>
</compile_context>

<pallas_src>
import functools
import math

import jax
import jax.numpy as jnp
from jax import lax
from jax.experimental import pallas as pl
from jax.experimental.pallas import tpu as pltpu

_LANE = 128
# softplus(_RHO_PAD) == 1  =>  padded (mu=0, sigma=1) entries contribute 0 KL.
_RHO_PAD = math.log(math.e - 1.0)
# MXU inputs for the stochastic paths (bf16-native on v6e/v7x, fine on v5e).
_MXU_DTYPE = jnp.bfloat16


def _pad_up(n, m=_LANE):
    return ((n + m - 1) // m) * m


def _pad_cols(a, d_pad):
    d = a.shape[-1]
    return a if d == d_pad else jnp.pad(a, ((0, 0), (0, d_pad - d)))


def _softplus(r):
    # numerically stable softplus (f32 on all chips; v5e has no bf16 VPU/EUP)
    return jnp.maximum(r, 0.0) + jnp.log1p(jnp.exp(-jnp.abs(r)))


def _col_mask(d_pad, d_valid):
    # [1, d_pad] f32 mask: 1 on valid output lanes, 0 on padding lanes
    return (lax.broadcasted_iota(jnp.int32, (1, d_pad), 1) < d_valid).astype(jnp.float32)


def _kl_sum(mu, sigma):
    # (1,1)-shaped sum of KL( N(mu, sigma^2) || N(0,1) )
    return jnp.sum(-jnp.log(jnp.maximum(sigma, 1e-12))
                   + 0.5 * (sigma * sigma + mu * mu) - 0.5, keepdims=True)


def _vmem_spec():
    return pl.BlockSpec(memory_space=pltpu.MemorySpace.VMEM)


def _vmem_limit(arrays):
    # Gridless kernels hold each operand exactly once in VMEM (no pipeline
    # double-buffering); size the scoped limit from the actual resident bytes
    # with headroom, clamped to v7x physical VMEM (64 MiB).
    n = sum(int(a.size) * a.dtype.itemsize for a in arrays)
    return int(min(max(2 * n + (4 << 20), 16 << 20), 64 << 20))


# ----------------------------------------------------------------------------
# Kernels
# ----------------------------------------------------------------------------

def _make_sigma_kl_kernel(n_layers, dims):
    """Prologue: sigma = softplus(rho) (column-masked) + analytic KL, computed once."""

    def kernel(*refs):
        p = 0
        params = []
        for _ in range(n_layers):
            params.append(tuple(refs[p:p + 4]))           # (w_mu, w_rho, b_mu, b_rho)
            p += 4
        sig_out = []
        for _ in range(n_layers):
            sig_out.append(tuple(refs[p:p + 2]))          # (w_sigma, b_sigma)
            p += 2
        kl_ref = refs[p]

        total = jnp.zeros((1, 1), jnp.float32)
        for l in range(n_layers):
            w_mu_r, w_rho_r, b_mu_r, b_rho_r = params[l]
            w_sig_r, b_sig_r = sig_out[l]
            _, dout_p, dout_v = dims[l]
            w_sig = _softplus(w_rho_r[...])
            b_sig = _softplus(b_rho_r[...])
            # padded entries have (mu=0, sigma=1) -> exactly zero KL contribution
            total = total + _kl_sum(w_mu_r[...], w_sig) + _kl_sum(b_mu_r[...], b_sig)
            # column-mask sigma so padded dout lanes sample to exactly 0 downstream,
            # keeping activation padding exactly zero through the whole net.
            m = _col_mask(dout_p, dout_v)
            w_sig_r[...] = w_sig * m
            b_sig_r[...] = b_sig * m
        kl_ref[...] = total

    return kernel


def _make_mc_kernel(n_layers, n_samples):
    """Fused MC likelihood: local reparameterization, samples stacked into M."""
    inv_n = 1.0 / float(n_samples)

    def kernel(*refs):
        x_ref, y_ref = refs[0], refs[1]
        p = 2
        layers = []
        for _ in range(n_layers):
            layers.append(tuple(refs[p:p + 5]))   # (w_mu, w_sigma, b_mu, b_sigma, eps)
            p += 5
        lk_ref = refs[p]

        h = x_ref[...]                            # (S*B, din_p), padded lanes are 0
        for l in range(n_layers):
            w_mu_r, w_sig_r, b_mu_r, b_sig_r, eps_r = layers[l]
            # Local reparameterization trick: layer pre-activations are
            #   N( h @ w_mu + b_mu , (h*h) @ w_sigma^2 + b_sigma^2 )
            # so eps is activation-shaped and no sampled W is materialized.
            w_sig = w_sig_r[...]
            b_sig = b_sig_r[...]
            mean = jnp.dot(h.astype(_MXU_DTYPE), w_mu_r[...].astype(_MXU_DTYPE),
                           preferred_element_type=jnp.float32) + b_mu_r[...]
            var = jnp.dot((h * h).astype(_MXU_DTYPE),
                          (w_sig * w_sig).astype(_MXU_DTYPE),
                          preferred_element_type=jnp.float32) + b_sig * b_sig
            # Padding invariant: mu is zero-padded and sigma is column-masked,
            # so padded activation lanes stay exactly 0 through every layer.
            h = mean + jnp.sqrt(jnp.maximum(var, 0.0)) * eps_r[...]
        diff = y_ref[...] - h                     # padded lanes: 0 - 0 = 0
        lk_ref[...] = inv_n * jnp.sum(-0.5 * diff * diff, keepdims=True)

    return kernel


def _make_single_kernel(n_layers):
    """Single stochastic pass (mode='forward'): weight-space sampling, all layers fused."""

    def kernel(*refs):
        x_ref = refs[0]
        p = 1
        layers = []
        for _ in range(n_layers):
            layers.append(tuple(refs[p:p + 6]))   # (w_mu, w_sig, b_mu, b_sig, w_eps, b_eps)
            p += 6
        out_ref = refs[p]
        h = x_ref[...]
        for l in range(n_layers):
            w_mu_r, w_sig_r, b_mu_r, b_sig_r, w_eps_r, b_eps_r = layers[l]
            # TODO(synk): for wide layers, chunk W = mu + sigma*eps over 128-wide
            # dout slabs (lax.fori_loop(unroll=True)) to bound vreg pressure.
            w = w_mu_r[...] + w_sig_r[...] * w_eps_r[...]
            b = b_mu_r[...] + b_sig_r[...] * b_eps_r[...]
            h = jnp.dot(h.astype(_MXU_DTYPE), w.astype(_MXU_DTYPE),
                        preferred_element_type=jnp.float32) + b
        out_ref[...] = h.astype(out_ref.dtype)

    return kernel


def _make_det_kernel(n_layers):
    """Deterministic pass (non-'forward' mode) with mean weights (kept f32 exact)."""

    def kernel(*refs):
        x_ref = refs[0]
        p = 1
        params = []
        for _ in range(n_layers):
            params.append((refs[p], refs[p + 1]))          # (w_mu, b_mu)
            p += 2
        out_ref = refs[p]
        h = x_ref[...]
        for w_mu_r, b_mu_r in params:
            h = jnp.dot(h, w_mu_r[...], preferred_element_type=jnp.float32) + b_mu_r[...]
        out_ref[...] = h.astype(out_ref.dtype)

    return kernel


# ----------------------------------------------------------------------------
# pallas_call wrappers
# ----------------------------------------------------------------------------

def _sigma_kl_pallas(flat_mu_rho, dims):
    n_layers = len(dims)
    out_shape = []
    for din_p, dout_p, _ in dims:
        out_shape.append(jax.ShapeDtypeStruct((din_p, dout_p), jnp.float32))
        out_shape.append(jax.ShapeDtypeStruct((1, dout_p), jnp.float32))
    out_shape.append(jax.ShapeDtypeStruct((1, 1), jnp.float32))
    res = pl.pallas_call(
        _make_sigma_kl_kernel(n_layers, dims),
        in_specs=[_vmem_spec()] * len(flat_mu_rho),
        out_specs=tuple(_vmem_spec() for _ in out_shape),
        out_shape=tuple(out_shape),
        compiler_params=pltpu.CompilerParams(
            vmem_limit_bytes=_vmem_limit(flat_mu_rho)),
    )(*flat_mu_rho)
    return list(res[:-1]), res[-1][0, 0]


def _mc_pallas(x_rep, y_rep, layer_inputs, n_samples):
    # TODO(synk): for large n_samples*B, add a row-tile grid ("parallel", with
    # per-tile partial lk outputs summed outside) so stacked activations
    # pipeline through VMEM and split across v7x's two TensorCores.
    n_layers = len(layer_inputs)
    flat = [x_rep, y_rep]
    for t in layer_inputs:
        flat.extend(t)
    lk = pl.pallas_call(
        _make_mc_kernel(n_layers, n_samples),
        in_specs=[_vmem_spec()] * len(flat),
        out_specs=_vmem_spec(),
        out_shape=jax.ShapeDtypeStruct((1, 1), jnp.float32),
        compiler_params=pltpu.CompilerParams(vmem_limit_bytes=_vmem_limit(flat)),
    )(*flat)
    return lk[0, 0]


def _single_pallas(x_p, layer_inputs, dout_p):
    n_layers = len(layer_inputs)
    flat = [x_p]
    for t in layer_inputs:
        flat.extend(t)
    return pl.pallas_call(
        _make_single_kernel(n_layers),
        in_specs=[_vmem_spec()] * len(flat),
        out_specs=_vmem_spec(),
        out_shape=jax.ShapeDtypeStruct((x_p.shape[0], dout_p), jnp.float32),
        compiler_params=pltpu.CompilerParams(vmem_limit_bytes=_vmem_limit(flat)),
    )(*flat)


def _det_pallas(x_p, flat_mean, dout_p):
    n_layers = len(flat_mean) // 2
    flat = [x_p] + list(flat_mean)
    return pl.pallas_call(
        _make_det_kernel(n_layers),
        in_specs=[_vmem_spec()] * len(flat),
        out_specs=_vmem_spec(),
        out_shape=jax.ShapeDtypeStruct((x_p.shape[0], dout_p), jnp.float32),
        compiler_params=pltpu.CompilerParams(vmem_limit_bytes=_vmem_limit(flat)),
    )(*flat)


# ----------------------------------------------------------------------------
# BNN container (mirrors the PyTorch module semantics)
# ----------------------------------------------------------------------------

class BayesLinearLayer:
    """Bayes-by-Backprop linear layer; parameters stored lane-padded to 128."""

    def __init__(self, key, in_features, out_features):
        self.in_features = in_features
        self.out_features = out_features
        self.in_pad = _pad_up(in_features)
        self.out_pad = _pad_up(out_features)
        k1, k2 = jax.random.split(key)
        w_mu = 0.1 * jax.random.normal(k1, (in_features, out_features), jnp.float32)
        b_mu = 0.1 * jax.random.normal(k2, (1, out_features), jnp.float32)
        # padded storage: mu padded with 0; rho padded with softplus^-1(1) so
        # padded entries have (mu=0, sigma=1) -> exactly zero analytic KL.
        self.w_mu = jnp.zeros((self.in_pad, self.out_pad), jnp.float32
                              ).at[:in_features, :out_features].set(w_mu)
        self.b_mu = jnp.zeros((1, self.out_pad), jnp.float32
                              ).at[:, :out_features].set(b_mu)
        self.w_rho = jnp.full((self.in_pad, self.out_pad), _RHO_PAD, jnp.float32
                              ).at[:in_features, :out_features].set(-3.0)
        self.b_rho = jnp.full((1, self.out_pad), _RHO_PAD, jnp.float32
                              ).at[:, :out_features].set(-3.0)

    def stochastic_params(self):
        return [self.w_mu, self.w_rho, self.b_mu, self.b_rho]

    def mean_params(self):
        return [self.w_mu, self.b_mu]


class BNN:
    def __init__(self, *layers):
        self.layers = list(layers)
        for a, b in zip(self.layers[:-1], self.layers[1:]):
            assert a.out_features == b.in_features and a.out_pad == b.in_pad
        dims = tuple((L.in_pad, L.out_pad, L.out_features) for L in self.layers)
        self.dims = dims
        n_layers = len(self.layers)

        @functools.partial(jax.jit, static_argnames=("n_samples",))
        def mc_fn(x_p, y_p, eps_list, flat_mu_rho, n_samples):
            sigmas, kl = _sigma_kl_pallas(flat_mu_rho, dims)
            x_rep = jnp.tile(x_p, (n_samples, 1))
            y_rep = jnp.tile(y_p, (n_samples, 1))
            layer_inputs = []
            for l in range(n_layers):
                w_mu, _, b_mu, _ = flat_mu_rho[4 * l:4 * l + 4]
                layer_inputs.append((w_mu, sigmas[2 * l], b_mu, sigmas[2 * l + 1],
                                     eps_list[l]))
            lk = _mc_pallas(x_rep, y_rep, layer_inputs, n_samples)
            return kl, lk

        @jax.jit
        def single_fn(x_p, eps_w, eps_b, flat_mu_rho):
            sigmas, kl = _sigma_kl_pallas(flat_mu_rho, dims)
            layer_inputs = []
            for l in range(n_layers):
                w_mu, _, b_mu, _ = flat_mu_rho[4 * l:4 * l + 4]
                layer_inputs.append((w_mu, sigmas[2 * l], b_mu, sigmas[2 * l + 1],
                                     eps_w[l], eps_b[l]))
            out_p = _single_pallas(x_p, layer_inputs, dims[-1][1])
            return out_p, kl

        @jax.jit
        def det_fn(x_p, flat_mean):
            return _det_pallas(x_p, flat_mean, dims[-1][1])

        self._mc_fn, self._single_fn, self._det_fn = mc_fn, single_fn, det_fn

    # ---- parameter / noise plumbing ----
    def _stochastic_flat(self):
        flat = []
        for L in self.layers:
            flat += L.stochastic_params()
        return flat

    def _mean_flat(self):
        flat = []
        for L in self.layers:
            flat += L.mean_params()
        return flat

    def _mc_eps(self, key, n_samples, batch):
        keys = jax.random.split(key, len(self.layers))
        return [jax.random.normal(k, (n_samples * batch, L.out_pad), jnp.float32)
                for k, L in zip(keys, self.layers)]

    def _single_eps(self, key):
        keys = jax.random.split(key, 2 * len(self.layers))
        eps_w, eps_b = [], []
        for i, L in enumerate(self.layers):
            eps_w.append(jax.random.normal(keys[2 * i], (L.in_pad, L.out_pad), jnp.float32))
            eps_b.append(jax.random.normal(keys[2 * i + 1], (1, L.out_pad), jnp.float32))
        return eps_w, eps_b

    # ---- public API (mirrors the PyTorch module) ----
    def forward(self, x, mode, key=None):
        x_p = _pad_cols(x, self.layers[0].in_pad)
        n_out = self.layers[-1].out_features
        if mode == 'forward':
            if key is None:
                key = jax.random.PRNGKey(0)
            eps_w, eps_b = self._single_eps(key)
            out_p, kl = self._single_fn(x_p, eps_w, eps_b, self._stochastic_flat())
            return out_p[:, :n_out], kl
        out_p = self._det_fn(x_p, self._mean_flat())
        return out_p[:, :n_out]

    def Forward(self, x, y, n_samples, key):
        x_p = _pad_cols(x, self.layers[0].in_pad)
        y_p = _pad_cols(y, self.layers[-1].out_pad)
        eps = self._mc_eps(key, n_samples, x.shape[0])
        # analytic KL is eps-independent, so total_kl / n_samples == kl exactly.
        return self._mc_fn(x_p, y_p, eps, self._stochastic_flat(),
                           n_samples=n_samples)

    @staticmethod
    def loss_fn(kl, lklh, n_batch):
        return jnp.mean(kl / n_batch - lklh)


# ----------------------------------------------------------------------------
# Demo + self-checks
# ----------------------------------------------------------------------------

if __name__ == "__main__":
    key = jax.random.PRNGKey(0)
    k_x, k_y, k_l1, k_l2, k_fwd = jax.random.split(key, 5)

    B, IN, HID, OUT, S = 8, 32, 32, 16, 2
    x = jax.random.normal(k_x, (B, IN), jnp.float32)
    y = jax.random.normal(k_y, (B, OUT), jnp.float32)

    model = BNN(BayesLinearLayer(k_l1, IN, HID),
                BayesLinearLayer(k_l2, HID, OUT))

    # mode='forward': stochastic pass + summed KL
    out, net_kl = model.forward(x, mode='forward', key=k_fwd)
    jax.block_until_ready((out, net_kl))

    # deterministic (non-'forward') mode
    out_det = model.forward(x, mode='map')
    jax.block_until_ready(out_det)

    # fused MC estimate: Forward(x, y, n_samples) + loss_fn
    kl_avg, lklh_avg = model.Forward(x, y, n_samples=S, key=k_fwd)
    loss = BNN.loss_fn(kl_avg, lklh_avg, n_batch=B)
    jax.block_until_ready(loss)

    # ---- pure-JAX reference checks (same eps arrays fed to the kernels) ----
    def _sp(r):
        return jnp.log1p(jnp.exp(r))

    def ref_det(xv):
        h = xv
        for L in model.layers:
            h = h @ L.w_mu[:L.in_features, :L.out_features] + L.b_mu[:, :L.out_features]
        return h

    def ref_kl():
        tot = 0.0
        for L in model.layers:
            for m, r in ((L.w_mu[:L.in_features, :L.out_features],
                          L.w_rho[:L.in_features, :L.out_features]),
                         (L.b_mu[:, :L.out_features], L.b_rho[:, :L.out_features])):
                s = _sp(r)
                tot = tot + jnp.sum(-jnp.log(s) + 0.5 * (s * s + m * m) - 0.5)
        return tot

    def ref_single(xv):
        eps_w, eps_b = model._single_eps(k_fwd)
        h = xv
        for L, ew, eb in zip(model.layers, eps_w, eps_b):
            i, o = L.in_features, L.out_features
            w = L.w_mu[:i, :o] + _sp(L.w_rho[:i, :o]) * ew[:i, :o]
            b = L.b_mu[:, :o] + _sp(L.b_rho[:, :o]) * eb[:, :o]
            h = h @ w + b
        return h

    def ref_mc(xv, yv):
        eps = model._mc_eps(k_fwd, S, B)
        h = jnp.tile(xv, (S, 1))
        for L, e in zip(model.layers, eps):
            i, o = L.in_features, L.out_features
            mean = h @ L.w_mu[:i, :o] + L.b_mu[:, :o]
            ws, bs = _sp(L.w_rho[:i, :o]), _sp(L.b_rho[:, :o])
            var = (h * h) @ (ws * ws) + bs * bs
            h = mean + jnp.sqrt(var) * e[:, :o]
        return jnp.sum(-0.5 * (jnp.tile(yv, (S, 1)) - h) ** 2) / S

    assert out.shape == (B, OUT) and out_det.shape == (B, OUT)
    assert net_kl.shape == () and kl_avg.shape == () and lklh_avg.shape == ()
    assert loss.shape == ()

    kl_ref = ref_kl()
    assert jnp.allclose(out_det, ref_det(x), rtol=1e-2, atol=1e-2)
    assert jnp.allclose(net_kl, kl_ref, rtol=1e-3, atol=1.0)
    assert jnp.allclose(kl_avg, kl_ref, rtol=1e-3, atol=1.0)
    assert jnp.allclose(out, ref_single(x), rtol=5e-2, atol=5e-2)
    lk_ref = ref_mc(x, y)
    assert abs(float(lklh_avg) - float(lk_ref)) <= 0.05 * abs(float(lk_ref)) + 5.0
    assert bool(jnp.isfinite(net_kl)) and bool(jnp.isfinite(lklh_avg)) and bool(jnp.isfinite(loss))
    print("KERNEL_OK")
</pallas_src>

<mosaic_0001>
module attributes {stable_mosaic.version = 11 : i64} {
  func.func @kernel(%arg0: memref<8x128xf32, #tpu.memory_space<vmem>>, %arg1: memref<128x128xf32, #tpu.memory_space<vmem>>, %arg2: memref<128x128xf32, #tpu.memory_space<vmem>>, %arg3: memref<1x128xf32, #tpu.memory_space<vmem>>, %arg4: memref<1x128xf32, #tpu.memory_space<vmem>>, %arg5: memref<128x128xf32, #tpu.memory_space<vmem>>, %arg6: memref<1x128xf32, #tpu.memory_space<vmem>>, %arg7: memref<128x128xf32, #tpu.memory_space<vmem>>, %arg8: memref<128x128xf32, #tpu.memory_space<vmem>>, %arg9: memref<1x128xf32, #tpu.memory_space<vmem>>, %arg10: memref<1x128xf32, #tpu.memory_space<vmem>>, %arg11: memref<128x128xf32, #tpu.memory_space<vmem>>, %arg12: memref<1x128xf32, #tpu.memory_space<vmem>>, %arg13: memref<8x128xf32, #tpu.memory_space<vmem>>) attributes {dimension_semantics = [], scalar_prefetch = 0 : i64, scratch_operands = 0 : i64, tpu.core_type = #tpu.core_type<tc>} {
    %c0 = arith.constant 0 : index
    %c0_0 = arith.constant 0 : index
    %0 = vector.load %arg0[%c0, %c0_0] : memref<8x128xf32, #tpu.memory_space<vmem>>, vector<8x128xf32>
    %c0_1 = arith.constant 0 : index
    %c0_2 = arith.constant 0 : index
    %1 = vector.load %arg1[%c0_1, %c0_2] : memref<128x128xf32, #tpu.memory_space<vmem>>, vector<128x128xf32>
    %c0_3 = arith.constant 0 : index
    %c0_4 = arith.constant 0 : index
    %2 = vector.load %arg2[%c0_3, %c0_4] : memref<128x128xf32, #tpu.memory_space<vmem>>, vector<128x128xf32>
    %c0_5 = arith.constant 0 : index
    %c0_6 = arith.constant 0 : index
    %3 = vector.load %arg5[%c0_5, %c0_6] : memref<128x128xf32, #tpu.memory_space<vmem>>, vector<128x128xf32>
    %4 = arith.mulf %2, %3 : vector<128x128xf32>
    %5 = arith.addf %1, %4 : vector<128x128xf32>
    %c0_7 = arith.constant 0 : index
    %c0_8 = arith.constant 0 : index
    %6 = vector.load %arg3[%c0_7, %c0_8] : memref<1x128xf32, #tpu.memory_space<vmem>>, vector<1x128xf32>
    %c0_9 = arith.constant 0 : index
    %c0_10 = arith.constant 0 : index
    %7 = vector.load %arg4[%c0_9, %c0_10] : memref<1x128xf32, #tpu.memory_space<vmem>>, vector<1x128xf32>
    %c0_11 = arith.constant 0 : index
    %c0_12 = arith.constant 0 : index
    %8 = vector.load %arg6[%c0_11, %c0_12] : memref<1x128xf32, #tpu.memory_space<vmem>>, vector<1x128xf32>
    %9 = arith.mulf %7, %8 : vector<1x128xf32>
    %10 = arith.addf %6, %9 : vector<1x128xf32>
    %11 = arith.truncf %0 : vector<8x128xf32> to vector<8x128xbf16>
    %12 = arith.truncf %5 : vector<128x128xf32> to vector<128x128xbf16>
    %cst = arith.constant dense<0.000000e+00> : vector<8x128xf32>
    %13 = tpu.matmul %11, %12, %cst {dimension_numbers = #tpu.dot_dimension_numbers<[1], [0], [0], [1], [0, 0, 1, 1], [], []>} : vector<8x128xbf16>, vector<128x128xbf16>, vector<8x128xf32> -> vector<8x128xf32>
    %14 = vector.broadcast %10 : vector<1x128xf32> to vector<8x128xf32>
    %15 = arith.addf %13, %14 : vector<8x128xf32>
    %c0_13 = arith.constant 0 : index
    %c0_14 = arith.constant 0 : index
    %16 = vector.load %arg7[%c0_13, %c0_14] : memref<128x128xf32, #tpu.memory_space<vmem>>, vector<128x128xf32>
    %c0_15 = arith.constant 0 : index
    %c0_16 = arith.constant 0 : index
    %17 = vector.load %arg8[%c0_15, %c0_16] : memref<128x128xf32, #tpu.memory_space<vmem>>, vector<128x128xf32>
    %c0_17 = arith.constant 0 : index
    %c0_18 = arith.constant 0 : index
    %18 = vector.load %arg11[%c0_17, %c0_18] : memref<128x128xf32, #tpu.memory_space<vmem>>, vector<128x128xf32>
    %19 = arith.mulf %17, %18 : vector<128x128xf32>
    %20 = arith.addf %16, %19 : vector<128x128xf32>
    %c0_19 = arith.constant 0 : index
    %c0_20 = arith.constant 0 : index
    %21 = vector.load %arg9[%c0_19, %c0_20] : memref<1x128xf32, #tpu.memory_space<vmem>>, vector<1x128xf32>
    %c0_21 = arith.constant 0 : index
    %c0_22 = arith.constant 0 : index
    %22 = vector.load %arg10[%c0_21, %c0_22] : memref<1x128xf32, #tpu.memory_space<vmem>>, vector<1x128xf32>
    %c0_23 = arith.constant 0 : index
    %c0_24 = arith.constant 0 : index
    %23 = vector.load %arg12[%c0_23, %c0_24] : memref<1x128xf32, #tpu.memory_space<vmem>>, vector<1x128xf32>
    %24 = arith.mulf %22, %23 : vector<1x128xf32>
    %25 = arith.addf %21, %24 : vector<1x128xf32>
    %26 = arith.truncf %15 : vector<8x128xf32> to vector<8x128xbf16>
    %27 = arith.truncf %20 : vector<128x128xf32> to vector<128x128xbf16>
    %cst_25 = arith.constant dense<0.000000e+00> : vector<8x128xf32>
    %28 = tpu.matmul %26, %27, %cst_25 {dimension_numbers = #tpu.dot_dimension_numbers<[1], [0], [0], [1], [0, 0, 1, 1], [], []>} : vector<8x128xbf16>, vector<128x128xbf16>, vector<8x128xf32> -> vector<8x128xf32>
    %29 = vector.broadcast %25 : vector<1x128xf32> to vector<8x128xf32>
    %30 = arith.addf %28, %29 : vector<8x128xf32>
    %c0_26 = arith.constant 0 : index
    %c0_27 = arith.constant 0 : index
    %31 = vector.load %arg13[%c0_26, %c0_27] : memref<8x128xf32, #tpu.memory_space<vmem>>, vector<8x128xf32>
    tpu.vector_store %arg13[%c0_26, %c0_27], %30 {strides = array<i32>} : memref<8x128xf32, #tpu.memory_space<vmem>>, vector<8x128xf32>,
    return
  }
}

module attributes {stable_mosaic.version = 11 : i64} {
  func.func @kernel(%arg0: memref<128x128xf32, #tpu.memory_space<vmem>>, %arg1: memref<128x128xf32, #tpu.memory_space<vmem>>, %arg2: memref<1x128xf32, #tpu.memory_space<vmem>>, %arg3: memref<1x128xf32, #tpu.memory_space<vmem>>, %arg4: memref<128x128xf32, #tpu.memory_space<vmem>>, %arg5: memref<128x128xf32, #tpu.memory_space<vmem>>, %arg6: memref<1x128xf32, #tpu.memory_space<vmem>>, %arg7: memref<1x128xf32, #tpu.memory_space<vmem>>, %arg8: memref<128x128xf32, #tpu.memory_space<vmem>>, %arg9: memref<1x128xf32, #tpu.memory_space<vmem>>, %arg10: memref<128x128xf32, #tpu.memory_space<vmem>>, %arg11: memref<1x128xf32, #tpu.memory_space<vmem>>, %arg12: memref<1x1xf32, #tpu.memory_space<vmem>>) attributes {dimension_semantics = [], scalar_prefetch = 0 : i64, scratch_operands = 0 : i64, tpu.core_type = #tpu.core_type<tc>} {
    %cst = arith.constant 0.000000e+00 : f32
    %0 = vector.broadcast %cst : f32 to vector<1x1xf32>
    %c0 = arith.constant 0 : index
    %c0_0 = arith.constant 0 : index
    %1 = vector.load %arg1[%c0, %c0_0] : memref<128x128xf32, #tpu.memory_space<vmem>>, vector<128x128xf32>
    %cst_1 = arith.constant 0.000000e+00 : f32
    %2 = vector.broadcast %cst_1 : f32 to vector<128x128xf32>
    %3 = arith.maximumf %1, %2 : vector<128x128xf32>
    %4 = math.absf %1 : vector<128x128xf32>
    %cst_2 = arith.constant 0.000000e+00 : f32
    %5 = vector.broadcast %cst_2 : f32 to vector<128x128xf32>
    %6 = arith.subf %5, %4 : vector<128x128xf32>
    %7 = math.exp %6 : vector<128x128xf32>
    %8 = math.log1p %7 : vector<128x128xf32>
    %9 = arith.addf %3, %8 : vector<128x128xf32>
    %c0_3 = arith.constant 0 : index
    %c0_4 = arith.constant 0 : index
    %10 = vector.load %arg3[%c0_3, %c0_4] : memref<1x128xf32, #tpu.memory_space<vmem>>, vector<1x128xf32>
    %cst_5 = arith.constant 0.000000e+00 : f32
    %11 = vector.broadcast %cst_5 : f32 to vector<1x128xf32>
    %12 = arith.maximumf %10, %11 : vector<1x128xf32>
    %13 = math.absf %10 : vector<1x128xf32>
    %cst_6 = arith.constant 0.000000e+00 : f32
    %14 = vector.broadcast %cst_6 : f32 to vector<1x128xf32>
    %15 = arith.subf %14, %13 : vector<1x128xf32>
    %16 = math.exp %15 : vector<1x128xf32>
    %17 = math.log1p %16 : vector<1x128xf32>
    %18 = arith.addf %12, %17 : vector<1x128xf32>
    %c0_7 = arith.constant 0 : index
    %c0_8 = arith.constant 0 : index
    %19 = vector.load %arg0[%c0_7, %c0_8] : memref<128x128xf32, #tpu.memory_space<vmem>>, vector<128x128xf32>
    %cst_9 = arith.constant 9.99999996E-13 : f32
    %20 = vector.broadcast %cst_9 : f32 to vector<128x128xf32>
    %21 = arith.maximumf %9, %20 : vector<128x128xf32>
    %22 = math.log %21 : vector<128x128xf32>
    %cst_10 = arith.constant 0.000000e+00 : f32
    %23 = vector.broadcast %cst_10 : f32 to vector<128x128xf32>
    %24 = arith.subf %23, %22 : vector<128x128xf32>
    %25 = arith.mulf %9, %9 : vector<128x128xf32>
    %26 = arith.mulf %19, %19 : vector<128x128xf32>
    %27 = arith.addf %25, %26 : vector<128x128xf32>
    %cst_11 = arith.constant 5.000000e-01 : f32
    %28 = vector.broadcast %cst_11 : f32 to vector<128x128xf32>
    %29 = arith.mulf %28, %27 : vector<128x128xf32>
    %30 = arith.addf %24, %29 : vector<128x128xf32>
    %cst_12 = arith.constant 5.000000e-01 : f32
    %31 = vector.broadcast %cst_12 : f32 to vector<128x128xf32>
    %32 = arith.subf %30, %31 : vector<128x128xf32>
    %33 = vector.shape_cast %32 : vector<128x128xf32> to vector<1x128x128xf32>
    %cst_13 = arith.constant dense<0.000000e+00> : vector<1xf32>
    %34 = vector.multi_reduction <add>, %33, %cst_13 [1, 2] : vector<1x128x128xf32> to vector<1xf32>
    %35 = vector.shape_cast %34 : vector<1xf32> to vector<1x1x1xf32>
    %36 = vector.extract %35[0, 0, 0] : f32 from vector<1x1x1xf32>
    %37 = vector.broadcast %36 : f32 to vector<1x1xf32>
    %38 = arith.addf %0, %37 : vector<1x1xf32>
    %c0_14 = arith.constant 0 : index
    %c0_15 = arith.constant 0 : index
    %39 = vector.load %arg2[%c0_14, %c0_15] : memref<1x128xf32, #tpu.memory_space<vmem>>, vector<1x128xf32>
    %cst_16 = arith.constant 9.99999996E-13 : f32
    %40 = vector.broadcast %cst_16 : f32 to vector<1x128xf32>
    %41 = arith.maximumf %18, %40 : vector<1x128xf32>
    %42 = math.log %41 : vector<1x128xf32>
    %cst_17 = arith.constant 0.000000e+00 : f32
    %43 = vector.broadcast %cst_17 : f32 to vector<1x128xf32>
    %44 = arith.subf %43, %42 : vector<1x128xf32>
    %45 = arith.mulf %18, %18 : vector<1x128xf32>
    %46 = arith.mulf %39, %39 : vector<1x128xf32>
    %47 = arith.addf %45, %46 : vector<1x128xf32>
    %cst_18 = arith.constant 5.000000e-01 : f32
    %48 = vector.broadcast %cst_18 : f32 to vector<1x128xf32>
    %49 = arith.mulf %48, %47 : vector<1x128xf32>
    %50 = arith.addf %44, %49 : vector<1x128xf32>
    %cst_19 = arith.constant 5.000000e-01 : f32
    %51 = vector.broadcast %cst_19 : f32 to vector<1x128xf32>
    %52 = arith.subf %50, %51 : vector<1x128xf32>
    %53 = vector.shape_cast %52 : vector<1x128xf32> to vector<1x1x128xf32>
    %cst_20 = arith.constant dense<0.000000e+00> : vector<1xf32>
    %54 = vector.multi_reduction <add>, %53, %cst_20 [1, 2] : vector<1x1x128xf32> to vector<1xf32>
    %55 = vector.shape_cast %54 : vector<1xf32> to vector<1x1x1xf32>
    %56 = vector.extract %55[0, 0, 0] : f32 from vector<1x1x1xf32>
    %57 = vector.broadcast %56 : f32 to vector<1x1xf32>
    %58 = arith.addf %38, %57 : vector<1x1xf32>
    %59 = tpu.iota {dimensions = array<i32: 1>} : vector<1x128xi32>
    %c32_i32 = arith.constant 32 : i32
    %60 = vector.broadcast %c32_i32 : i32 to vector<1x128xi32>
    %61 = arith.cmpi slt, %59, %60 : vector<1x128xi32>
    %62 = arith.extui %61 : vector<1x128xi1> to vector<1x128xi32>
    %63 = arith.sitofp %62 : vector<1x128xi32> to vector<1x128xf32>
    %64 = vector.broadcast %63 : vector<1x128xf32> to vector<128x128xf32>
    %65 = arith.mulf %9, %64 : vector<128x128xf32>
    %c0_21 = arith.constant 0 : index
    %c0_22 = arith.constant 0 : index
    %66 = vector.load %arg8[%c0_21, %c0_22] : memref<128x128xf32, #tpu.memory_space<vmem>>, vector<128x128xf32>
    tpu.vector_store %arg8[%c0_21, %c0_22], %65 {strides = array<i32>} : memref<128x128xf32, #tpu.memory_space<vmem>>, vector<128x128xf32>,
    %67 = arith.mulf %18, %63 : vector<1x128xf32>
    %c0_23 = arith.constant 0 : index
    %c0_24 = arith.constant 0 : index
    %68 = vector.load %arg9[%c0_23, %c0_24] : memref<1x128xf32, #tpu.memory_space<vmem>>, vector<1x128xf32>
    tpu.vector_store %arg9[%c0_23, %c0_24], %67 {strides = array<i32>} : memref<1x128xf32, #tpu.memory_space<vmem>>, vector<1x128xf32>,
    %c0_25 = arith.constant 0 : index
    %c0_26 = arith.constant 0 : index
    %69 = vector.load %arg5[%c0_25, %c0_26] : memref<128x128xf32, #tpu.memory_space<vmem>>, vector<128x128xf32>
    %cst_27 = arith.constant 0.000000e+00 : f32
    %70 = vector.broadcast %cst_27 : f32 to vector<128x128xf32>
    %71 = arith.maximumf %69, %70 : vector<128x128xf32>
    %72 = math.absf %69 : vector<128x128xf32>
    %cst_28 = arith.constant 0.000000e+00 : f32
    %73 = vector.broadcast %cst_28 : f32 to vector<128x128xf32>
    %74 = arith.subf %73, %72 : vector<128x128xf32>
    %75 = math.exp %74 : vector<128x128xf32>
    %76 = math.log1p %75 : vector<128x128xf32>
    %77 = arith.addf %71, %76 : vector<128x128xf32>
    %c0_29 = arith.constant 0 : index
    %c0_30 = arith.constant 0 : index
    %78 = vector.load %arg7[%c0_29, %c0_30] : memref<1x128xf32, #tpu.memory_space<vmem>>, vector<1x128xf32>
    %cst_31 = arith.constant 0.000000e+00 : f32
    %79 = vector.broadcast %cst_31 : f32 to vector<1x128xf32>
    %80 = arith.maximumf %78, %79 : vector<1x128xf32>
    %81 = math.absf %78 : vector<1x128xf32>
    %cst_32 = arith.constant 0.000000e+00 : f32
    %82 = vector.broadcast %cst_32 : f32 to vector<1x128xf32>
    %83 = arith.subf %82, %81 : vector<1x128xf32>
    %84 = math.exp %83 : vector<1x128xf32>
    %85 = math.log1p %84 : vector<1x128xf32>
    %86 = arith.addf %80, %85 : vector<1x128xf32>
    %c0_33 = arith.constant 0 : index
    %c0_34 = arith.constant 0 : index
    %87 = vector.load %arg4[%c0_33, %c0_34] : memref<128x128xf32, #tpu.memory_space<vmem>>, vector<128x128xf32>
    %cst_35 = arith.constant 9.99999996E-13 : f32
    %88 = vector.broadcast %cst_35 : f32 to vector<128x128xf32>
    %89 = arith.maximumf %77, %88 : vector<128x128xf32>
    %90 = math.log %89 : vector<128x128xf32>
    %cst_36 = arith.constant 0.000000e+00 : f32
    %91 = vector.broadcast %cst_36 : f32 to vector<128x128xf32>
    %92 = arith.subf %91, %90 : vector<128x128xf32>
    %93 = arith.mulf %77, %77 : vector<128x128xf32>
    %94 = arith.mulf %87, %87 : vector<128x128xf32>
    %95 = arith.addf %93, %94 : vector<128x128xf32>
    %cst_37 = arith.constant 5.000000e-01 : f32
    %96 = vector.broadcast %cst_37 : f32 to vector<128x128xf32>
    %97 = arith.mulf %96, %95 : vector<128x128xf32>
    %98 = arith.addf %92, %97 : vector<128x128xf32>
    %cst_38 = arith.constant 5.000000e-01 : f32
    %99 = vector.broadcast %cst_38 : f32 to vector<128x128xf32>
    %100 = arith.subf %98, %99 : vector<128x128xf32>
    %101 = vector.shape_cast %100 : vector<128x128xf32> to vector<1x128x128xf32>
    %cst_39 = arith.constant dense<0.000000e+00> : vector<1xf32>
    %102 = vector.multi_reduction <add>, %101, %cst_39 [1, 2] : vector<1x128x128xf32> to vector<1xf32>
    %103 = vector.shape_cast %102 : vector<1xf32> to vector<1x1x1xf32>
    %104 = vector.extract %103[0, 0, 0] : f32 from vector<1x1x1xf32>
    %105 = vector.broadcast %104 : f32 to vector<1x1xf32>
    %106 = arith.addf %58, %105 : vector<1x1xf32>
    %c0_40 = arith.constant 0 : index
    %c0_41 = arith.constant 0 : index
    %107 = vector.load %arg6[%c0_40, %c0_41] : memref<1x128xf32, #tpu.memory_space<vmem>>, vector<1x128xf32>
    %cst_42 = arith.constant 9.99999996E-13 : f32
    %108 = vector.broadcast %cst_42 : f32 to vector<1x128xf32>
    %109 = arith.maximumf %86, %108 : vector<1x128xf32>
    %110 = math.log %109 : vector<1x128xf32>
    %cst_43 = arith.constant 0.000000e+00 : f32
    %111 = vector.broadcast %cst_43 : f32 to vector<1x128xf32>
    %112 = arith.subf %111, %110 : vector<1x128xf32>
    %113 = arith.mulf %86, %86 : vector<1x128xf32>
    %114 = arith.mulf %107, %107 : vector<1x128xf32>
    %115 = arith.addf %113, %114 : vector<1x128xf32>
    %cst_44 = arith.constant 5.000000e-01 : f32
    %116 = vector.broadcast %cst_44 : f32 to vector<1x128xf32>
    %117 = arith.mulf %116, %115 : vector<1x128xf32>
    %118 = arith.addf %112, %117 : vector<1x128xf32>
    %cst_45 = arith.constant 5.000000e-01 : f32
    %119 = vector.broadcast %cst_45 : f32 to vector<1x128xf32>
    %120 = arith.subf %118, %119 : vector<1x128xf32>
    %121 = vector.shape_cast %120 : vector<1x128xf32> to vector<1x1x128xf32>
    %cst_46 = arith.constant dense<0.000000e+00> : vector<1xf32>
    %122 = vector.multi_reduction <add>, %121, %cst_46 [1, 2] : vector<1x1x128xf32> to vector<1xf32>
    %123 = vector.shape_cast %122 : vector<1xf32> to vector<1x1x1xf32>
    %124 = vector.extract %123[0, 0, 0] : f32 from vector<1x1x1xf32>
    %125 = vector.broadcast %124 : f32 to vector<1x1xf32>
    %126 = arith.addf %106, %125 : vector<1x1xf32>
    %127 = tpu.iota {dimensions = array<i32: 1>} : vector<1x128xi32>
    %c16_i32 = arith.constant 16 : i32
    %128 = vector.broadcast %c16_i32 : i32 to vector<1x128xi32>
    %129 = arith.cmpi slt, %127, %128 : vector<1x128xi32>
    %130 = arith.extui %129 : vector<1x128xi1> to vector<1x128xi32>
    %131 = arith.sitofp %130 : vector<1x128xi32> to vector<1x128xf32>
    %132 = vector.broadcast %131 : vector<1x128xf32> to vector<128x128xf32>
    %133 = arith.mulf %77, %132 : vector<128x128xf32>
    %c0_47 = arith.constant 0 : index
    %c0_48 = arith.constant 0 : index
    %134 = vector.load %arg10[%c0_47, %c0_48] : memref<128x128xf32, #tpu.memory_space<vmem>>, vector<128x128xf32>
    tpu.vector_store %arg10[%c0_47, %c0_48], %133 {strides = array<i32>} : memref<128x128xf32, #tpu.memory_space<vmem>>, vector<128x128xf32>,
    %135 = arith.mulf %86, %131 : vector<1x128xf32>
    %c0_49 = arith.constant 0 : index
    %c0_50 = arith.constant 0 : index
    %136 = vector.load %arg11[%c0_49, %c0_50] : memref<1x128xf32, #tpu.memory_space<vmem>>, vector<1x128xf32>
    tpu.vector_store %arg11[%c0_49, %c0_50], %135 {strides = array<i32>} : memref<1x128xf32, #tpu.memory_space<vmem>>, vector<1x128xf32>,
    %c0_51 = arith.constant 0 : index
    %c0_52 = arith.constant 0 : index
    %137 = vector.load %arg12[%c0_51, %c0_52] : memref<1x1xf32, #tpu.memory_space<vmem>>, vector<1x1xf32>
    tpu.vector_store %arg12[%c0_51, %c0_52], %126 {strides = array<i32>} : memref<1x1xf32, #tpu.memory_space<vmem>>, vector<1x1xf32>,
    return
  }
}

</mosaic_0001>

<bundles_post_ra>
// kernel: single_fn.3
= control target key start
LH: loop header
LB: loop body
LE: loop exit
PB: predicated region body
PF: predicated region fallthrough
CT: control target
= control target key end

     0   :  { %v427_v3 = vmov 0.0   ;;  %vm428_vm0 = vmmov 0   ;;  %s839_s0 = inlined_call_operand.vmem [shape: f32[8,128], index: 0, kind: input, shape index: {}]   ;;  %s840_s1 = inlined_call_operand.vmem [shape: f32[128,128], index: 1, kind: input, shape index: {}]   ;;  %s841_s2 = inlined_call_operand.vmem [shape: f32[128,128], index: 2, kind: input, shape index: {}]   ;;  %s842_s3 = inlined_call_operand.vmem [shape: f32[1,128], index: 3, kind: input, shape index: {}]   ;;  %s843_s4 = inlined_call_operand.vmem [shape: f32[1,128], index: 4, kind: input, shape index: {}]   ;;  %s844_s5 = inlined_call_operand.vmem [shape: f32[128,128], index: 5, kind: input, shape index: {}]   ;;  %s845_s6 = inlined_call_operand.vmem [shape: f32[1,128], index: 6, kind: input, shape index: {}]   ;;  %s846_s7 = inlined_call_operand.vmem [shape: f32[128,128], index: 7, kind: input, shape index: {}]   ;;  %s847_s8 = inlined_call_operand.vmem [shape: f32[128,128], index: 8, kind: input, shape index: {}]   ;;  %s848_s9 = inlined_call_operand.vmem [shape: f32[1,128], index: 9, kind: input, shape index: {}]   ;;  %s849_s10 = inlined_call_operand.vmem [shape: f32[1,128], index: 10, kind: input, shape index: {}]   ;;  %s850_s11 = inlined_call_operand.vmem [shape: f32[128,128], index: 11, kind: input, shape index: {}]   ;;  %s851_s12 = inlined_call_operand.vmem [shape: f32[1,128], index: 12, kind: input, shape index: {}]   ;;  %s852_s13 = inlined_call_operand.hbm [shape: f32[8,128], index: 13, kind: output, shape index: {}]  }
   0x1   :  { %v47_v0 = vld [vmem:[%s840_s1] sm:$0xff]  ;;  %v48_v1 = vld [vmem:[%s840_s1 + $0x8] sm:$0xff]  ;;  %360 = vmatprep.subr.bf16.mxu0 %v427_v3  ;;  %376 = vmatprep.mubr.msk.bf16.mxu0 %vm428_vm0, %v427_v3  ;;  %v49_v9 = vld [vmem:[%s840_s1 + $0x10] sm:$0xff] }
   0x2   :  { %v63_v2 = vld [vmem:[%s841_s2] sm:$0xff]  ;;  %v64_v4 = vld [vmem:[%s841_s2 + $0x8] sm:$0xff]  ;;  %v50_v10 = vld [vmem:[%s840_s1 + $0x18] sm:$0xff]  ;;  %380 = vmatprep.subr.bf16.mxu1 %v427_v3  ;;  %396 = vmatprep.mubr.msk.bf16.mxu1 %vm428_vm0, %v427_v3 }
   0x3   :  { %v79_v5 = vld [vmem:[%s844_s5] sm:$0xff]  ;;  %v80_v6 = vld [vmem:[%s844_s5 + $0x8] sm:$0xff]  ;;  %v65_v11 = vld [vmem:[%s841_s2 + $0x10] sm:$0xff] }
   0x4   :  { %v95_v7 = vmul.f32 %v79_v5, %v63_v2  ;;  %v96_v8 = vmul.f32 %v80_v6, %v64_v4  ;;  %v66_v12 = vld [vmem:[%s841_s2 + $0x18] sm:$0xff]  ;;  %v81_v13 = vld [vmem:[%s844_s5 + $0x10] sm:$0xff]  ;;  %v51_v19 = vld [vmem:[%s840_s1 + $0x20] sm:$0xff] }
   0x5   :  { %v82_v14 = vld [vmem:[%s844_s5 + $0x18] sm:$0xff]  ;;  %v97_v17 = vmul.f32 %v81_v13, %v65_v11  ;;  %v67_v20 = vld [vmem:[%s841_s2 + $0x20] sm:$0xff]  ;;  %v68_v21 = vld [vmem:[%s841_s2 + $0x28] sm:$0xff] }
   0x6   :  { %v111_v15 = vadd.f32 %v95_v7, %v47_v0  ;;  %v112_v16 = vadd.f32 %v96_v8, %v48_v1  ;;  %v98_v18 = vmul.f32 %v82_v14, %v66_v12  ;;  %v83_v22 = vld [vmem:[%s844_s5 + $0x20] sm:$0xff]  ;;  %v84_v23 = vld [vmem:[%s844_s5 + $0x28] sm:$0xff]  ;;  %v69_v29 = vld [vmem:[%s841_s2 + $0x30] sm:$0xff] }
   0x7   :  { %v113_v25 = vadd.f32 %v97_v17, %v49_v9  ;;  %v52_v27 = vld [vmem:[%s840_s1 + $0x28] sm:$0xff]  ;;  %v99_v28 = vmul.f32 %v83_v22, %v67_v20  ;;  %v100_v30 = vmul.f32 %v84_v23, %v68_v21  ;;  %v70_v31 = vld [vmem:[%s841_s2 + $0x38] sm:$0xff]  ;;  %v85_v32 = vld [vmem:[%s844_s5 + $0x30] sm:$0xff] }
   0x8   :  { %v133_v24 = vpack.c.bf16 %v112_v16, %v111_v15  ;;  %v114_v26 = vadd.f32 %v98_v18, %v50_v10  ;;  %v86_v33 = vld [vmem:[%s844_s5 + $0x38] sm:$0xff]  ;;  %v53_v36 = vld [vmem:[%s840_s1 + $0x30] sm:$0xff]  ;;  %v101_v38 = vmul.f32 %v85_v32, %v69_v29  ;;  %v71_v40 = vld [vmem:[%s841_s2 + $0x40] sm:$0xff] }
   0x9   :  { %v115_v35 = vadd.f32 %v99_v28, %v51_v19  ;;  %v54_v37 = vld [vmem:[%s840_s1 + $0x38] sm:$0xff]  ;;  %v102_v39 = vmul.f32 %v86_v33, %v70_v31  ;;  %v116_v41 = vadd.f32 %v100_v30, %v52_v27  ;;  %v72_v42 = vld [vmem:[%s841_s2 + $0x48] sm:$0xff]  ;;  %v87_v43 = vld [vmem:[%s844_s5 + $0x40] sm:$0xff] }
   0xa   :  { %361 = vmatpush3.bf16.msra.mxu0 %v133_v24  ;;  %v134_v34 = vpack.c.bf16 %v114_v26, %v113_v25  ;;  %v88_v44 = vld [vmem:[%s844_s5 + $0x48] sm:$0xff]  ;;  %v103_v45 = vmul.f32 %v87_v43, %v71_v40  ;;  %v117_v48 = vadd.f32 %v101_v38, %v53_v36  ;;  %v55_v50 = vld [vmem:[%s840_s1 + $0x40] sm:$0xff]  ;;  %v73_v52 = vld [vmem:[%s841_s2 + $0x50] sm:$0xff] }
   0xb   :  { %362 = vmatprep.subr.bf16.mxu0 %v427_v3  ;;  %v104_v46 = vmul.f32 %v88_v44, %v72_v42  ;;  %v135_v47 = vpack.c.bf16 %v116_v41, %v115_v35  ;;  %v118_v49 = vadd.f32 %v102_v39, %v54_v37  ;;  %v56_v51 = vld [vmem:[%s840_s1 + $0x48] sm:$0xff]  ;;  %v74_v53 = vld [vmem:[%s841_s2 + $0x58] sm:$0xff]  ;;  %v89_v54 = vld [vmem:[%s844_s5 + $0x50] sm:$0xff] }
   0xc   :  { %v90_v55 = vld [vmem:[%s844_s5 + $0x58] sm:$0xff]  ;;  %v75_v56 = vld [vmem:[%s841_s2 + $0x60] sm:$0xff]  ;;  %v119_v57 = vadd.f32 %v103_v45, %v55_v50  ;;  %v76_v59 = vld [vmem:[%s841_s2 + $0x68] sm:$0xff]  ;;  %v105_v1 = vmul.f32 %v89_v54, %v73_v52 }
   0xd   :  { %v120_v58 = vadd.f32 %v104_v46, %v56_v51  ;;  %v91_v60 = vld [vmem:[%s844_s5 + $0x60] sm:$0xff]  ;;  %v92_v61 = vld [vmem:[%s844_s5 + $0x68] sm:$0xff]  ;;  %v136_v62 = vpack.c.bf16 %v118_v49, %v117_v48  ;;  %v57_v63 = vld [vmem:[%s840_s1 + $0x50] sm:$0xff]  ;;  %v106_v2 = vmul.f32 %v90_v55, %v74_v53 }
   0xe   :  { %363 = vmatpush3.bf16.msra.mxu0 %v134_v34  ;;  %v58_v0 = vld [vmem:[%s840_s1 + $0x58] sm:$0xff]  ;;  %v187_v4 = vld [vmem:[%s846_s7] sm:$0xff]  ;;  %v60_v6 = vld [vmem:[%s840_s1 + $0x68] sm:$0xff]  ;;  %v107_v10 = vmul.f32 %v91_v60, %v75_v56  ;;  %v108_v11 = vmul.f32 %v92_v61, %v76_v59  ;;  %v121_v25 = vadd.f32 %v105_v1, %v57_v63 }
   0xf   :  { %364 = vmatprep.subr.bf16.mxu0 %v427_v3  ;;  %v59_v5 = vld [vmem:[%s840_s1 + $0x60] sm:$0xff]  ;;  %v204_v8 = vld [vmem:[%s847_s8 + $0x8] sm:$0xff]  ;;  %v77_v12 = vld [vmem:[%s841_s2 + $0x70] sm:$0xff]  ;;  %v137_v18 = vpack.c.bf16 %v120_v58, %v119_v57  ;;  %v122_v26 = vadd.f32 %v106_v2, %v58_v0 }
  0x10   :  { %v203_v7 = vld [vmem:[%s847_s8] sm:$0xff]  ;;  %v93_v13 = vld [vmem:[%s844_s5 + $0x70] sm:$0xff]  ;;  %v188_v14 = vld [vmem:[%s846_s7 + $0x8] sm:$0xff]  ;;  %v123_v37 = vadd.f32 %v107_v10, %v59_v5  ;;  %v124_v38 = vadd.f32 %v108_v11, %v60_v6 }
  0x11   :  { %v219_v9 = vld [vmem:[%s850_s11] sm:$0xff]  ;;  %v220_v15 = vld [vmem:[%s850_s11 + $0x8] sm:$0xff]  ;;  %v189_v17 = vld [vmem:[%s846_s7 + $0x10] sm:$0xff]  ;;  %v109_v43 = vmul.f32 %v93_v13, %v77_v12  ;;  %v138_v50 = vpack.c.bf16 %v122_v26, %v121_v25 }
  0x12   :  { %365 = vmatpush3.bf16.msra.mxu0 %v135_v47  ;;  %v235_v16 = vmul.f32 %v219_v9, %v203_v7  ;;  %v78_v19 = vld [vmem:[%s841_s2 + $0x78] sm:$0xff]  ;;  %v236_v21 = vmul.f32 %v220_v15, %v204_v8  ;;  %v205_v22 = vld [vmem:[%s847_s8 + $0x10] sm:$0xff]  ;;  %v191_v31 = vld [vmem:[%s846_s7 + $0x20] sm:$0xff]  ;;  %v139_v2 = vpack.c.bf16 %v124_v38, %v123_v37 }
  0x13   :  { %366 = vmatprep.subr.bf16.mxu0 %v427_v3  ;;  %v94_v20 = vld [vmem:[%s844_s5 + $0x78] sm:$0xff]  ;;  %v221_v24 = vld [vmem:[%s850_s11 + $0x10] sm:$0xff]  ;;  %v207_v34 = vld [vmem:[%s847_s8 + $0x20] sm:$0xff] }
  0x14   :  { %v206_v23 = vld [vmem:[%s847_s8 + $0x18] sm:$0xff]  ;;  %v251_v27 = vadd.f32 %v235_v16, %v187_v4  ;;  %v237_v30 = vmul.f32 %v221_v24, %v205_v22  ;;  %v252_v32 = vadd.f32 %v236_v21, %v188_v14  ;;  %v208_v35 = vld [vmem:[%s847_s8 + $0x28] sm:$0xff]  ;;  %v223_v36 = vld [vmem:[%s850_s11 + $0x20] sm:$0xff]  ;;  %v110_v53 = vmul.f32 %v94_v20, %v78_v19 }
  0x15   :  { %v190_v28 = vld [vmem:[%s846_s7 + $0x18] sm:$0xff]  ;;  %v192_v40 = vld [vmem:[%s846_s7 + $0x28] sm:$0xff]  ;;  %v239_v42 = vmul.f32 %v223_v36, %v207_v34  ;;  %v209_v47 = vld [vmem:[%s847_s8 + $0x30] sm:$0xff] }
  0x16   :  { %367 = vmatpush3.bf16.msra.mxu0 %v136_v62  ;;  %v222_v29 = vld [vmem:[%s850_s11 + $0x18] sm:$0xff]  ;;  %v253_v39 = vadd.f32 %v237_v30, %v189_v17  ;;  %v224_v41 = vld [vmem:[%s850_s11 + $0x28] sm:$0xff]  ;;  %v273_v44 = vpack.c.bf16 %v252_v32, %v251_v27  ;;  %v225_v49 = vld [vmem:[%s850_s11 + $0x30] sm:$0xff] }
  0x17   :  { %368 = vmatprep.subr.bf16.mxu0 %v427_v3  ;;  %v238_v33 = vmul.f32 %v222_v29, %v206_v23  ;;  %v240_v46 = vmul.f32 %v224_v41, %v208_v35  ;;  %v210_v48 = vld [vmem:[%s847_s8 + $0x38] sm:$0xff]  ;;  %v61_v51 = vld [vmem:[%s840_s1 + $0x70] sm:$0xff]  ;;  %v255_v54 = vadd.f32 %v239_v42, %v191_v31  ;;  %v241_v56 = vmul.f32 %v225_v49, %v209_v47  ;;  %v211_v61 = vld [vmem:[%s847_s8 + $0x40] sm:$0xff] }
  0x18   :  { %v62_v52 = vld [vmem:[%s840_s1 + $0x78] sm:$0xff]  ;;  %381 = vmatpush3.bf16.msra.mxu1 %v273_v44  ;;  %v193_v59 = vld [vmem:[%s846_s7 + $0x30] sm:$0xff]  ;;  %v227_v62 = vld [vmem:[%s850_s11 + $0x40] sm:$0xff]  ;;  %v125_v4 = vadd.f32 %v109_v43, %v61_v51 }
  0x19   :  { %v254_v45 = vadd.f32 %v238_v33, %v190_v28  ;;  %v226_v55 = vld [vmem:[%s850_s11 + $0x38] sm:$0xff]  ;;  %v256_v58 = vadd.f32 %v240_v46, %v192_v40  ;;  %382 = vmatprep.subr.bf16.mxu1 %v427_v3  ;;  %v212_v0 = vld [vmem:[%s847_s8 + $0x48] sm:$0xff]  ;;  %v126_v5 = vadd.f32 %v110_v53, %v62_v52  ;;  %v257_v6 = vadd.f32 %v241_v56, %v193_v59  ;;  %v195_v10 = vld [vmem:[%s846_s7 + $0x40] sm:$0xff] }
  0x1a   :  { %369 = vmatpush3.bf16.msra.mxu0 %v137_v18  ;;  %v242_v60 = vmul.f32 %v226_v55, %v210_v48  ;;  %v194_v63 = vld [vmem:[%s846_s7 + $0x38] sm:$0xff]  ;;  %v228_v1 = vld [vmem:[%s850_s11 + $0x48] sm:$0xff]  ;;  %v243_v7 = vmul.f32 %v227_v62, %v211_v61  ;;  %v213_v12 = vld [vmem:[%s847_s8 + $0x50] sm:$0xff] }
  0x1b   :  { %370 = vmatprep.subr.bf16.mxu0 %v427_v3  ;;  %v274_v57 = vpack.c.bf16 %v254_v45, %v253_v39  ;;  %v275_v8 = vpack.c.bf16 %v256_v58, %v255_v54  ;;  %v244_v11 = vmul.f32 %v228_v1, %v212_v0  ;;  %v229_v13 = vld [vmem:[%s850_s11 + $0x50] sm:$0xff]  ;;  %v196_v14 = vld [vmem:[%s846_s7 + $0x48] sm:$0xff]  ;;  %v214_v15 = vld [vmem:[%s847_s8 + $0x58] sm:$0xff] }
  0x1c   :  { %v258_v9 = vadd.f32 %v242_v60, %v194_v63  ;;  %v230_v16 = vld [vmem:[%s850_s11 + $0x58] sm:$0xff] }
  0x1d   :  { %383 = vmatpush3.bf16.msra.mxu1 %v274_v57 }
  0x1e   :  { %371 = vmatpush3.bf16.msra.mxu0 %v138_v50  ;;  %384 = vmatprep.subr.bf16.mxu1 %v427_v3 }
  0x1f   :  { %372 = vmatprep.subr.bf16.mxu0 %v427_v3 }
  0x20   :  { %18 = vsyncpa [#allocation3], 0  ;;  %v140_v17 = vpack.c.bf16 %v126_v5, %v125_v4  ;;  %v46_v18 = vld [vmem:[%s839_s0] sm:$0xff]  ;;  %v259_v19 = vadd.f32 %v243_v7, %v195_v10  ;;  %v245_v20 = vmul.f32 %v229_v13, %v213_v12  ;;  %v276_v21 = vpack.c.bf16 %v258_v9, %v257_v6  ;;  %v197_v23 = vld [vmem:[%s846_s7 + $0x50] sm:$0xff]  ;;  %s429_s23 = smov [#allocation2]  }
  0x21   :  { %385 = vmatpush3.bf16.msra.mxu1 %v275_v8  ;;  %v260_v22 = vadd.f32 %v244_v11, %v196_v14  ;;  %v198_v24 = vld [vmem:[%s846_s7 + $0x58] sm:$0xff]  ;;  %v246_v25 = vmul.f32 %v230_v16, %v214_v15  ;;  %v215_v26 = vld [vmem:[%s847_s8 + $0x60] sm:$0xff]  ;;  %v216_v27 = vld [vmem:[%s847_s8 + $0x68] sm:$0xff]  ;;  %v132_v30 = vpack.c.bf16 %v46_v18, %v46_v18  ;;  %v142_v52 = vlaneseq  ;;  %s334_s24 = sshll.u32 %s429_s23, 4  ;;  %s335_s24 = int_to_ptr.vmem [resolvable:$true] %s334_s24 }
  0x22   :  { %373 = vmatpush3.bf16.msra.mxu0 %v139_v2  ;;  %386 = vmatprep.subr.bf16.mxu1 %v427_v3  ;;  %v231_v28 = vld [vmem:[%s850_s11 + $0x60] sm:$0xff]  ;;  %v232_v29 = vld [vmem:[%s850_s11 + $0x68] sm:$0xff]  ;;  %v261_v31 = vadd.f32 %v245_v20, %v197_v23  ;;  %v217_v42 = vld [vmem:[%s847_s8 + $0x70] sm:$0xff]  ;;  %p408_p1 = scmp.lt.s32.totalorder %s335_s24, %s335_s24 }
  0x23   :  { %374 = vmatprep.subr.bf16.mxu0 %v427_v3  ;;  %v277_v32 = vpack.c.bf16 %v260_v22, %v259_v19  ;;  %v262_v33 = vadd.f32 %v246_v25, %v198_v24  ;;  %v247_v34 = vmul.f32 %v231_v28, %v215_v26  ;;  %v248_v35 = vmul.f32 %v232_v29, %v216_v27  ;;  %v199_v36 = vld [vmem:[%s846_s7 + $0x60] sm:$0xff]  ;;  %v200_v37 = vld [vmem:[%s846_s7 + $0x68] sm:$0xff]  ;;  %v218_v43 = vld [vmem:[%s847_s8 + $0x78] sm:$0xff] }
  0x24   :  { %v233_v44 = vld [vmem:[%s850_s11 + $0x70] sm:$0xff]  ;;  %v234_v45 = vld [vmem:[%s850_s11 + $0x78] sm:$0xff]  ;;  %v128_v53 = vld [vmem:[%s843_s4] sm:$0x1]  ;;  %v143_v56 = vshrl.u32 %v142_v52, 7 }
  0x25   :  { %387 = vmatpush3.bf16.msra.mxu1 %v276_v21  ;;  %v278_v38 = vpack.c.bf16 %v262_v33, %v261_v31  ;;  %v263_v39 = vadd.f32 %v247_v34, %v199_v36  ;;  %v264_v40 = vadd.f32 %v248_v35, %v200_v37  ;;  %v249_v46 = vmul.f32 %v233_v44, %v217_v42  ;;  %v202_v47 = vld [vmem:[%s846_s7 + $0x78] sm:$0xff]  ;;  %v129_v54 = vld [vmem:[%s845_s6] sm:$0x1] }
  0x26   :  { %375 = vmatpush3.bf16.msra.mxu0 %v140_v17  ;;  %388 = vmatprep.subr.bf16.mxu1 %v427_v3  ;;  %v250_v48 = vmul.f32 %v234_v45, %v218_v43  ;;  %v130_v55 = vmul.f32 %v129_v54, %v128_v53  ;;  %v127_v57 = vld [vmem:[%s842_s3] sm:$0x1]  ;;  %v144_v59 = vsub.s32 0, %v143_v56 }
  0x27   :  { %v279_v41 = vpack.c.bf16 %v264_v40, %v263_v39  ;;  %v268_v4 = vld [vmem:[%s849_s10] sm:$0x1]  ;;  %s403_s10 = scalar_lea.vmem %s335_s24, 128 }
  0x28   :  { %v266_v50 = vadd.f32 %v250_v48, %v202_v47  ;;  %v131_v58 = vadd.f32 %v130_v55, %v127_v57  ;;  %v269_v5 = vld [vmem:[%s851_s12] sm:$0x1]  ;;  %p404_p0 = scmp.ne.s32.totalorder %s335_s24, %s403_s10  ;;  %p409_p2 = scmp.lt.s32.totalorder %s403_s10, %s403_s10 }
  0x29   :  { %377 = vmatmul.mubr.bf16.vlgmr.msra.gmra.mrb[0].mxu0 %v132_v30  ;;  %389 = vmatpush3.bf16.msra.mxu1 %v277_v32  ;;  %v270_v6 = vmul.f32 %v269_v5, %v268_v4  ;;  %v267_v7 = vld [vmem:[%s848_s9] sm:$0x1] }
  0x2a   :  { %390 = vmatprep.subr.bf16.mxu1 %v427_v3  ;;  %v145_v60 = vrot.slane %v131_v58, %v144_v59  ;;  %p410_p3 = por %p409_p2, %p408_p1 }
  0x2b   :  { %v271_v8 = vadd.f32 %v270_v6, %v267_v7 }
  0x2c   :  { %p411_p4 = pnand %p410_p3, %p404_p0 }
  0x2d   :  { %391 = vmatpush3.bf16.msra.mxu1 %v278_v38  ;;  %v285_v9 = vrot.slane %v271_v8, %v144_v59 }
  0x2e   :  { %392 = vmatprep.subr.bf16.mxu1 %v427_v3 }
  0x31   :  { %393 = vmatpush3.bf16.msra.mxu1 %v279_v41 }
  0x32   :  { %394 = vmatprep.subr.bf16.mxu1 %v427_v3  ;;  %v201_v3 = vld [vmem:[%s846_s7 + $0x70] sm:$0xff] }
  0x33   :  { %v265_v49 = vadd.f32 %v249_v46, %v201_v3 }
  0x35   :  { %v280_v51 = vpack.c.bf16 %v266_v50, %v265_v49 }
  0x37   :  { %395 = vmatpush3.bf16.msra.mxu1 %v280_v51 }
  0xfc   :  { %v181_v61 = vpop.f32.mrb[0].mxu0 }
  0xfd   :  { %v182_v62 = vadd.f32 %v181_v61, %v145_v60  ;;  %v378_v63 = vpop.f32.mrb[1].mxu0 }
  0xfe   :  { %v184_v0 = vpop.f32.mrb[2].mxu0 }
  0xff   :  { %v272_v1 = vpack.c.bf16 %v182_v62, %v182_v62  ;;  %v379_v2 = vpop.f32.mrb[3].mxu0 }
 0x101   :  { %397 = vmatmul.mubr.bf16.vlgmr.msra.gmra.mrb[0].mxu1 %v272_v1 }
 0x1d4   :  { %v321_v10 = vpop.f32.mrb[0].mxu1 }
 0x1d5   :  { %v322_v11 = vadd.f32 %v321_v10, %v285_v9  ;;  %v398_v12 = vpop.f32.mrb[1].mxu1 }
 0x1d6   :  { %v324_v13 = vpop.f32.mrb[2].mxu1 }
 0x1d7   :  { %327 = vst [vmem:[#allocation2] sm:$0xff] %v322_v11  ;;  %v399_v14 = vpop.f32.mrb[3].mxu1 }
 0x1d8   :  { %414 = shalt.err (!%p411_p4)
}
 0x1d9   :  { %s415_s25 = scalar_lea.hbm %s852_s13, 128 }
 0x1da   :  { %p416_p5 = scmp.ne.s32.totalorder %s852_s13, %s415_s25  ;;  %p419_p6 = scmp.lt.u32.totalorder %s415_s25, %s852_s13 }
 0x1dc   :  { %p421_p7 = pnand %p419_p6, %p416_p5 }
 0x1de   :  { %424 = shalt.err (!%p421_p7)
}
 0x1df   :  { %337 = dma.vmem_to_hbm [thread:$0]  %s335_s24, 128, %s852_s13, [#allocation3]  }
 0x1e0   :  { %425 = dma.done.wait [#allocation3], 128  }
 0x1e1   :  { %426 = vsyncadd [#allocation3], 4294967168 }
 0x1e2   :  { %341 = vsyncpa [#allocation3], 1 }

// kernel: single_fn.2
= control target key start
LH: loop header
LB: loop body
LE: loop exit
PB: predicated region body
PF: predicated region fallthrough
CT: control target
= control target key end

     0   :  { %18 = vsyncpa [#allocation3], 0  ;;  %s2937_s0 = inlined_call_operand.hbm [shape: f32[128,128], index: 0, kind: input, shape index: {}]   ;;  %s2938_s1 = inlined_call_operand.hbm [shape: f32[128,128], index: 1, kind: input, shape index: {}]   ;;  %s2939_s2 = inlined_call_operand.vmem [shape: f32[1,128], index: 2, kind: input, shape index: {}]   ;;  %s2940_s3 = inlined_call_operand.vmem [shape: f32[1,128], index: 3, kind: input, shape index: {}]   ;;  %s2941_s4 = inlined_call_operand.hbm [shape: f32[128,128], index: 4, kind: input, shape index: {}]   ;;  %s2942_s5 = inlined_call_operand.hbm [shape: f32[128,128], index: 5, kind: input, shape index: {}]   ;;  %s2943_s6 = inlined_call_operand.vmem [shape: f32[1,128], index: 6, kind: input, shape index: {}]   ;;  %s2944_s7 = inlined_call_operand.vmem [shape: f32[1,128], index: 7, kind: input, shape index: {}]   ;;  %s2945_s8 = inlined_call_operand.vmem [shape: f32[128,128], index: 8, kind: output, shape index: {0}]   ;;  %s2946_s9 = inlined_call_operand.vmem [shape: f32[1,128], index: 9, kind: output, shape index: {1}]   ;;  %s2947_s10 = inlined_call_operand.vmem [shape: f32[128,128], index: 10, kind: output, shape index: {2}]   ;;  %s2948_s11 = inlined_call_operand.vmem [shape: f32[1,128], index: 11, kind: output, shape index: {3}]   ;;  %s2949_s12 = inlined_call_operand.hbm [shape: f32[1,1], index: 12, kind: output, shape index: {4}]  }
   0x1   :  { %19 = vsyncpa [#allocation6], 0 }
   0x2   :  { %20 = vsyncpa [#allocation9], 0 }
   0x3   :  { %21 = vsyncpa [#allocation4], 0  ;;  %s1570_s21 = smov [#allocation5]   ;;  %s1571_s23 = smov [#allocation2]  }
   0x4   :  { %s39_s22 = sshll.u32 %s1570_s21, 4  ;;  %s27_s24 = sshll.u32 %s1571_s23, 4  ;;  %s40_s22 = int_to_ptr.vmem [resolvable:$true] %s39_s22  ;;  %s1643_s24 = int_to_ptr.vmem [resolvable:$true] %s27_s24 }
   0x5   :  { %s1452_s27 = scalar_lea.hbm %s2938_s1, 2048 }
   0x6   :  { %p1453_p0 = scmp.ne.s32.totalorder %s2938_s1, %s1452_s27  ;;  %p1456_p1 = scmp.lt.u32.totalorder %s1452_s27, %s2938_s1 }
   0x8   :  { %p1458_p2 = pnand %p1456_p1, %p1453_p0 }
   0xa   :  { %1461 = shalt.err (!%p1458_p2)
}
   0xb   :  { %s1462_s14 = scalar_lea.vmem %s40_s22, 2048  ;;  %p1467_p4 = scmp.lt.s32.totalorder %s40_s22, %s40_s22 }
   0xc   :  { %p1463_p3 = scmp.ne.s32.totalorder %s40_s22, %s1462_s14  ;;  %p1468_p5 = scmp.lt.s32.totalorder %s1462_s14, %s1462_s14 }
   0xe   :  { %p1469_p6 = por %p1468_p5, %p1467_p4 }
  0x10   :  { %p1470_p7 = pnand %p1469_p6, %p1463_p3 }
  0x12   :  { %1473 = shalt.err (!%p1470_p7)
}
  0x13   :  { %s1572_s15 = smov 128   ;;  %s1573_s16 = smov 8  }
  0x14   :  { %45 = dma.hbm_to_vmem [thread:$0]  %s2938_s1, 2048, %s40_s22, [#allocation6], %s1572_s15, %s1572_s15, %s1573_s16  }
  0x15   :  { %s1474_s21 = scalar_lea.hbm %s2937_s0, 2048 }
  0x16   :  { %p1475_p8 = scmp.ne.s32.totalorder %s2937_s0, %s1474_s21  ;;  %p1478_p9 = scmp.lt.u32.totalorder %s1474_s21, %s2937_s0 }
  0x18   :  { %p1480_p10 = pnand %p1478_p9, %p1475_p8 }
  0x1a   :  { %1483 = shalt.err (!%p1480_p10)
}
  0x1b   :  { %s1484_s28 = scalar_lea.vmem %s1643_s24, 2048  ;;  %p1489_p12 = scmp.lt.s32.totalorder %s1643_s24, %s1643_s24 }
  0x1c   :  { %p1485_p11 = scmp.ne.s32.totalorder %s1643_s24, %s1484_s28  ;;  %p1490_p13 = scmp.lt.s32.totalorder %s1484_s28, %s1484_s28 }
  0x1e   :  { %p1491_p0 = por %p1490_p13, %p1489_p12 }
  0x20   :  { %p1492_p1 = pnand %p1491_p0, %p1485_p11 }
  0x22   :  { %1495 = shalt.err (!%p1492_p1)
}
  0x23   :  { %33 = dma.hbm_to_vmem [thread:$0]  %s2937_s0, 2048, %s1643_s24, [#allocation3], %s1572_s15, %s1572_s15, %s1573_s16  }
  0x24   :  { %s1574_s29 = smov [#allocation7]   ;;  %s1575_s13 = smov [#allocation8]  }
  0x25   :  { %s55_s30 = sshll.u32 %s1574_s29, 4  ;;  %s67_s14 = sshll.u32 %s1575_s13, 4  ;;  %s56_s30 = int_to_ptr.vmem [resolvable:$true] %s55_s30  ;;  %s1680_s14 = int_to_ptr.vmem [resolvable:$true] %s67_s14 }
  0x26   :  { %s1496_s19 = scalar_lea.hbm %s2941_s4, 2048 }
  0x27   :  { %p1497_p2 = scmp.ne.s32.totalorder %s2941_s4, %s1496_s19  ;;  %p1500_p3 = scmp.lt.u32.totalorder %s1496_s19, %s2941_s4 }
  0x29   :  { %p1502_p4 = pnand %p1500_p3, %p1497_p2 }
  0x2b   :  { %1505 = shalt.err (!%p1502_p4)
}
  0x2c   :  { %s1506_s0 = scalar_lea.vmem %s56_s30, 2048  ;;  %p1511_p6 = scmp.lt.s32.totalorder %s56_s30, %s56_s30 }
  0x2d   :  { %p1507_p5 = scmp.ne.s32.totalorder %s56_s30, %s1506_s0  ;;  %p1512_p7 = scmp.lt.s32.totalorder %s1506_s0, %s1506_s0 }
  0x2f   :  { %p1513_p8 = por %p1512_p7, %p1511_p6 }
  0x31   :  { %p1514_p9 = pnand %p1513_p8, %p1507_p5 }
  0x33   :  { %1517 = shalt.err (!%p1514_p9)
}
  0x34   :  { %61 = dma.hbm_to_vmem [thread:$0]  %s2941_s4, 2048, %s56_s30, [#allocation6], %s1572_s15, %s1572_s15, %s1573_s16  }
  0x35   :  { %s1518_s1 = scalar_lea.hbm %s2942_s5, 2048 }
  0x36   :  { %p1519_p10 = scmp.ne.s32.totalorder %s2942_s5, %s1518_s1  ;;  %p1522_p11 = scmp.lt.u32.totalorder %s1518_s1, %s2942_s5 }
  0x38   :  { %p1524_p12 = pnand %p1522_p11, %p1519_p10 }
  0x3a   :  { %1527 = shalt.err (!%p1524_p12)
}
  0x3b   :  { %s1528_s18 = scalar_lea.vmem %s1680_s14, 2048  ;;  %p1533_p0 = scmp.lt.s32.totalorder %s1680_s14, %s1680_s14 }
  0x3c   :  { %p1529_p13 = scmp.ne.s32.totalorder %s1680_s14, %s1528_s18  ;;  %p1534_p1 = scmp.lt.s32.totalorder %s1528_s18, %s1528_s18 }
  0x3e   :  { %p1535_p2 = por %p1534_p1, %p1533_p0 }
  0x40   :  { %p1536_p3 = pnand %p1535_p2, %p1529_p13 }
  0x42   :  { %1539 = shalt.err (!%p1536_p3)
}
  0x43   :  { %73 = dma.hbm_to_vmem [thread:$0]  %s2942_s5, 2048, %s1680_s14, [#allocation9], %s1572_s15, %s1572_s15, %s1573_s16  }
  0x44   :  { %1562 = dma.done.wait [#allocation3], 2048  }
  0x45   :  { %1563 = vsyncadd [#allocation3], 4294965248 }
  0x46   :  { %1564 = dma.done.wait [#allocation6], 4096  }
  0x47   :  { %1565 = vsyncadd [#allocation6], 4294963200 }
  0x48   :  { %1566 = dma.done.wait [#allocation9], 2048  }
  0x49   :  { %1567 = vsyncadd [#allocation9], 4294965248  ;;  %v1717_v0 = vld [vmem:[#allocation8] sm:$0xff]  ;;  %v1719_v1 = vld [vmem:[#allocation8 + $0x8] sm:$0xff]  ;;  %v588_v5 = vlaneseq  ;;  %s1577_s14 = smov [#allocation10]  }
  0x4a   :  { %v1721_v2 = vld [vmem:[#allocation8 + $0x10] sm:$0xff]  ;;  %v659_v3 = vand.u32 2147483647, %v1717_v0  ;;  %v660_v4 = vand.u32 2147483647, %v1719_v1  ;;  %v1725_v6 = vld [vmem:[#allocation8 + $0x18] sm:$0xff] }
  0x4b   :  { %v661_v7 = vand.u32 2147483647, %v1721_v2  ;;  %v1728_v8 = vld [vmem:[#allocation8 + $0x20] sm:$0xff]  ;;  %v1730_v10 = vld [vmem:[#allocation8 + $0x28] sm:$0xff]  ;;  %v662_v11 = vand.u32 2147483647, %v1725_v6 }
  0x4c   :  { %v675_v9 = vsub.f32 0.0, %v659_v3  ;;  %v676_v12 = vsub.f32 0.0, %v660_v4  ;;  %v1733_v13 = vand.u32 127, %v588_v5  ;;  %v1735_v14 = vld [vmem:[#allocation8 + $0x30] sm:$0xff]  ;;  %v1737_v16 = vld [vmem:[#allocation8 + $0x38] sm:$0xff]  ;;  %v1743_v21 = vld [vmem:[#allocation8 + $0x40] sm:$0xff] }
  0x4d   :  { %v677_v15 = vsub.f32 0.0, %v661_v7  ;;  %v663_v20 = vand.u32 2147483647, %v1728_v8  ;;  %v664_v23 = vand.u32 2147483647, %v1730_v10  ;;  %v1747_v25 = vld [vmem:[#allocation8 + $0x48] sm:$0xff] }
  0x4e   :  { %2954 = vst [vmem:[#allocation15_spill] sm:$0xff] %v1733_v13  ;;  %v691_v24 = vmul.f32 1.442695, %v675_v9  ;;  %v665_v26 = vand.u32 2147483647, %v1735_v14  ;;  %v678_v27 = vsub.f32 0.0, %v662_v11 }
  0x4f   :  { %v693_v28 = vmul.f32 1.442695, %v676_v12  ;;  %v1750_v29 = vld [vmem:[#allocation8 + $0x50] sm:$0xff]  ;;  %v666_v31 = vand.u32 2147483647, %v1737_v16  ;;  %v1754_v33 = vld [vmem:[#allocation8 + $0x58] sm:$0xff] }
  0x50   :  { %v695_v32 = vmul.f32 1.442695, %v677_v15  ;;  %v1756_v34 = vld [vmem:[#allocation8 + $0x60] sm:$0xff]  ;;  %v667_v36 = vand.u32 2147483647, %v1743_v21  ;;  %v679_v37 = vsub.f32 0.0, %v663_v20  ;;  %1248 = vpow2.f32 %v691_v24 }
  0x51   :  { %v1760_v38 = vld [vmem:[#allocation8 + $0x68] sm:$0xff]  ;;  %v668_v40 = vand.u32 2147483647, %v1747_v25  ;;  %v680_v41 = vsub.f32 0.0, %v664_v23  ;;  %v1764_v42 = vld [vmem:[#allocation8 + $0x70] sm:$0xff]  ;;  %v681_v44 = vsub.f32 0.0, %v665_v26  ;;  %1250 = vpow2.f32 %v693_v28 }
  0x52   :  { %v669_v43 = vand.u32 2147483647, %v1750_v29  ;;  %v697_v45 = vmul.f32 1.442695, %v678_v27  ;;  %v1767_v46 = vld [vmem:[#allocation8 + $0x78] sm:$0xff]  ;;  %v682_v49 = vsub.f32 0.0, %v666_v31  ;;  %1252 = vpow2.f32 %v695_v32 }
  0x53   :  { %v670_v47 = vand.u32 2147483647, %v1754_v33  ;;  %v671_v48 = vand.u32 2147483647, %v1756_v34  ;;  %v672_v51 = vand.u32 2147483647, %v1760_v38 }
  0x54   :  { %v683_v52 = vsub.f32 0.0, %v667_v36  ;;  %v699_v53 = vmul.f32 1.442695, %v679_v37  ;;  %v673_v55 = vand.u32 2147483647, %v1764_v42  ;;  %v684_v56 = vsub.f32 0.0, %v668_v40 }
  0x55   :  { %v701_v57 = vmul.f32 1.442695, %v680_v41  ;;  %v674_v58 = vand.u32 2147483647, %v1767_v46  ;;  %v685_v59 = vsub.f32 0.0, %v669_v43  ;;  %1254 = vpow2.f32 %v697_v45  ;;  %v899_v15 = vld [vmem:[#allocation7] sm:$0xff] }
  0x56   :  { %v703_v60 = vmul.f32 1.442695, %v681_v44  ;;  %v686_v63 = vsub.f32 0.0, %v670_v47  ;;  %v705_v3 = vmul.f32 1.442695, %v682_v49  ;;  %v687_v5 = vsub.f32 0.0, %v671_v48 }
  0x57   :  { %1256 = vpow2.f32 %v699_v53  ;;  %v707_v7 = vmul.f32 1.442695, %v683_v52  ;;  %v688_v11 = vsub.f32 0.0, %v672_v51  ;;  %v709_v12 = vmul.f32 1.442695, %v684_v56  ;;  %v900_v26 = vld [vmem:[#allocation7 + $0x8] sm:$0xff] }
  0x58   :  { %1258 = vpow2.f32 %v701_v57  ;;  %v689_v20 = vsub.f32 0.0, %v673_v55  ;;  %v690_v23 = vsub.f32 0.0, %v674_v58  ;;  %v711_v24 = vmul.f32 1.442695, %v685_v59  ;;  %v901_v27 = vld [vmem:[#allocation7 + $0x10] sm:$0xff]  ;;  %v902_v43 = vld [vmem:[#allocation7 + $0x18] sm:$0xff] }
  0x59   :  { %1260 = vpow2.f32 %v703_v60  ;;  %v713_v36 = vmul.f32 1.442695, %v686_v63  ;;  %v715_v41 = vmul.f32 1.442695, %v687_v5  ;;  %v1787_v44 = vmul.f32 %v899_v15, %v899_v15  ;;  %v903_v48 = vld [vmem:[#allocation7 + $0x20] sm:$0xff]  ;;  %v904_v49 = vld [vmem:[#allocation7 + $0x28] sm:$0xff] }
  0x5a   :  { %v1780_v28 = vpop.eup %1248  ;;  %1262 = vpow2.f32 %v705_v3  ;;  %v717_v47 = vmul.f32 1.442695, %v688_v11  ;;  %v905_v51 = vld [vmem:[#allocation7 + $0x30] sm:$0xff]  ;;  %v1791_v52 = vmul.f32 %v900_v26, %v900_v26  ;;  %v1793_v53 = vmul.f32 %v901_v27, %v901_v27  ;;  %v906_v58 = vld [vmem:[#allocation7 + $0x38] sm:$0xff]  ;;  %v907_v63 = vld [vmem:[#allocation7 + $0x40] sm:$0xff]  ;;  %s1177_s19 = sshll.u32 %s1577_s14, 4  ;;  %s1178_s19 = int_to_ptr.vmem [resolvable:$true] %s1177_s19 }
  0x5b   :  { %v1784_v37 = vpop.eup %1250  ;;  %1264 = vpow2.f32 %v707_v7  ;;  %v719_v55 = vmul.f32 1.442695, %v689_v20  ;;  %v721_v56 = vmul.f32 1.442695, %v690_v23  ;;  %v723_v57 = vadd.f32 1.0, %v1780_v28  ;;  %v908_v3 = vld [vmem:[#allocation7 + $0x48] sm:$0xff]  ;;  %p1545_p5 = scmp.lt.s32.totalorder %s1178_s19, %s1178_s19 }
  0x5c   :  { %v1789_v45 = vpop.eup %1252  ;;  %1266 = vpow2.f32 %v709_v12  ;;  %2955 = vst [vmem:[#allocation16_spill] sm:$0xff] %v1793_v53  ;;  %v726_v59 = vmul.f32 -0.5, %v1780_v28  ;;  %v732_v60 = vadd.f32 1.0, %v1784_v37  ;;  %v909_v5 = vld [vmem:[#allocation7 + $0x50] sm:$0xff]  ;;  %v1798_v7 = vmul.f32 %v902_v43, %v902_v43  ;;  %v910_v20 = vld [vmem:[#allocation7 + $0x58] sm:$0xff]  ;;  %s1540_s20 = scalar_lea.vmem %s1178_s19, 16 }
  0x5d   :  { %1268 = vpow2.f32 %v711_v24  ;;  %v735_v12 = vmul.f32 -0.5, %v1784_v37  ;;  %v741_v15 = vadd.f32 1.0, %v1789_v45  ;;  %v1804_v23 = vmul.f32 %v903_v48, %v903_v48  ;;  %v911_v24 = vld [vmem:[#allocation7 + $0x60] sm:$0xff]  ;;  %p1541_p4 = scmp.ne.s32.totalorder %s1178_s19, %s1540_s20  ;;  %s1544_s21 = scalar_lea.vmem %s1178_s19, 32 }
  0x5e   :  { %1270 = vpow2.f32 %v713_v36  ;;  %2956 = vst [vmem:[#allocation17_spill] sm:$0xff] %v1798_v7  ;;  %v1806_v26 = vmul.f32 %v904_v49, %v904_v49  ;;  %v1808_v27 = vmul.f32 %v905_v51, %v905_v51  ;;  %v1810_v36 = vmul.f32 %v906_v58, %v906_v58  ;;  %p1546_p6 = scmp.lt.s32.totalorder %s1544_s21, %s1540_s20 }
  0x5f   :  { %v1800_v11 = vpop.eup %1254  ;;  %1272 = vpow2.f32 %v715_v41  ;;  %2957 = vst [vmem:[#allocation18_spill] sm:$0xff] %v1804_v23  ;;  %v1814_v40 = vmul.f32 %v907_v63, %v907_v63  ;;  %v1816_v41 = vmul.f32 %v908_v3, %v908_v3  ;;  %v1818_v32 = vmul.f32 %v909_v5, %v909_v5  ;;  %v912_v63 = vld [vmem:[#allocation7 + $0x68] sm:$0xff] }
  0x60   :  { %1274 = vpow2.f32 %v717_v47  ;;  %2958 = vst [vmem:[#allocation19_spill] sm:$0xff] %v1806_v26  ;;  %2959 = vst [vmem:[#allocation20_spill] sm:$0xff] %v1808_v27  ;;  %v727_v48 = vadd.f32 1.0, %v726_v59  ;;  %v750_v47 = vadd.f32 1.0, %v1800_v11  ;;  %v1823_v49 = vmul.f32 %v910_v20, %v910_v20  ;;  %p1547_p7 = por %p1546_p6, %p1545_p5 }
  0x61   :  { %2960 = vst [vmem:[#allocation21_spill] sm:$0xff] %v1810_v36  ;;  %v1812_v43 = vpop.eup %1256  ;;  %1276 = vlog2.f32 %v723_v57  ;;  %2961 = vst [vmem:[#allocation22_spill] sm:$0xff] %v1814_v40  ;;  %v736_v58 = vadd.f32 1.0, %v735_v12  ;;  %v744_v57 = vmul.f32 -0.5, %v1789_v45  ;;  %v1828_v9 = vmul.f32 %v911_v24, %v911_v24 }
  0x62   :  { %2962 = vst [vmem:[#allocation23_spill] sm:$0xff] %v1816_v41  ;;  %2963 = vst [vmem:[#allocation24_spill] sm:$0xff] %v1818_v32  ;;  %v1820_v31 = vpop.eup %1258  ;;  %1278 = vlog2.f32 %v732_v60  ;;  %v729_v5 = vand.u32 2147483647, %v1780_v28  ;;  %v753_v59 = vmul.f32 -0.5, %v1800_v11  ;;  %v759_v60 = vadd.f32 1.0, %v1812_v43  ;;  %p1548_p8 = pnand %p1547_p7, %p1541_p4 }
  0x63   :  { %2964 = vst [vmem:[#allocation25_spill] sm:$0xff] %v1823_v49  ;;  %v1825_v51 = vpop.eup %1260  ;;  %1280 = vlog2.f32 %v741_v15  ;;  %2965 = vst [vmem:[#allocation26_spill] sm:$0xff] %v1828_v9  ;;  %v738_v12 = vand.u32 2147483647, %v1784_v37  ;;  %v747_v15 = vand.u32 2147483647, %v1789_v45  ;;  %v1843_v62 = vmul.f32 %v1780_v28, %v727_v48 }
  0x64   :  { %v1830_v3 = vpop.eup %1262  ;;  %1282 = vpow2.f32 %v719_v55  ;;  %v768_v4 = vadd.f32 1.0, %v1820_v31  ;;  %v762_v55 = vmul.f32 -0.5, %v1812_v43  ;;  %v1846_v61 = vmul.f32 %v912_v63, %v912_v63 }
  0x65   :  { %v1835_v20 = vpop.eup %1264  ;;  %1284 = vpow2.f32 %v721_v56  ;;  %v1851_v56 = vmul.f32 %v1784_v37, %v736_v58  ;;  %v745_v50 = vadd.f32 1.0, %v744_v57  ;;  %v756_v39 = vand.u32 2147483647, %v1800_v11 }
  0x66   :  { %v1840_v24 = vpop.eup %1266  ;;  %1286 = vlog2.f32 %v750_v47  ;;  %2966 = vst [vmem:[#allocation27_spill] sm:$0xff] %v1846_v61  ;;  %v777_v35 = vadd.f32 1.0, %v1825_v51  ;;  %vm1857_vm0 = vcmp.lt.f32.partialorder %v729_v5, 0.0004427343  ;;  %v754_v48 = vadd.f32 1.0, %v753_v59 }
  0x67   :  { %v1848_v54 = vpop.eup %1268  ;;  %1288 = vlog2.f32 %v759_v60  ;;  %v771_v47 = vmul.f32 -0.5, %v1820_v31  ;;  %v786_v63 = vadd.f32 1.0, %v1830_v3  ;;  %vm1865_vm1 = vcmp.lt.f32.partialorder %v738_v12, 0.0004427343 }
  0x68   :  { %v1855_v30 = vpop.eup %1270  ;;  %vm1869_vm2 = vcmp.lt.f32.partialorder %v747_v15, 0.0004427343  ;;  %1290 = vlog2.f32 %v768_v4  ;;  %v780_v57 = vmul.f32 -0.5, %v1825_v51  ;;  %v795_v5 = vadd.f32 1.0, %v1835_v20 }
  0x69   :  { %v1863_v22 = vpop.eup %1272  ;;  %v763_v60 = vadd.f32 1.0, %v762_v55  ;;  %v765_v19 = vand.u32 2147483647, %v1812_v43  ;;  %v789_v18 = vmul.f32 -0.5, %v1830_v3  ;;  %v804_v12 = vadd.f32 1.0, %v1840_v24 }
  0x6a   :  { %v1875_v59 = vpop.eup %1274  ;;  %v1881_v15 = vmul.f32 %v1789_v45, %v745_v50  ;;  %v774_v61 = vand.u32 2147483647, %v1820_v31  ;;  %1292 = vlog2.f32 %v777_v35  ;;  %v798_v4 = vmul.f32 -0.5, %v1835_v20 }
  0x6b   :  { %v1277_v17 = vpop.eup %1276  ;;  %v1886_v49 = vmul.f32 %v1800_v11, %v754_v48  ;;  %vm1888_vm3 = vcmp.lt.f32.partialorder %v756_v39, 0.0004427343  ;;  %v772_v32 = vadd.f32 1.0, %v771_v47  ;;  %1294 = vlog2.f32 %v786_v63 }
  0x6c   :  { %v1279_v9 = vpop.eup %1278  ;;  %v781_v40 = vadd.f32 1.0, %v780_v57  ;;  %v783_v50 = vand.u32 2147483647, %v1825_v51  ;;  %1296 = vlog2.f32 %v795_v5  ;;  %v813_v45 = vadd.f32 1.0, %v1848_v54 }
  0x6d   :  { %v1281_v41 = vpop.eup %1280  ;;  %v1897_v36 = vmul.f32 %v1812_v43, %v763_v60  ;;  %vm1899_vm4 = vcmp.lt.f32.partialorder %v765_v19, 0.0004427343  ;;  %v790_v39 = vadd.f32 1.0, %v789_v18  ;;  %v792_v48 = vand.u32 2147483647, %v1830_v3 }
  0x6e   :  { %v1894_v35 = vpop.eup %1282  ;;  %1298 = vlog2.f32 %v804_v12  ;;  %v1906_v63 = vmul.f32 0.6931472, %v1277_v17  ;;  %vm1908_vm5 = vcmp.lt.f32.partialorder %v774_v61, 0.0004427343  ;;  %v799_v5 = vadd.f32 1.0, %v798_v4 }
  0x6f   :  { %v1904_v47 = vpop.eup %1284  ;;  %v801_v43 = vand.u32 2147483647, %v1835_v20  ;;  %v807_v19 = vmul.f32 -0.5, %v1840_v24  ;;  %v1914_v27 = vmul.f32 0.6931472, %v1279_v9  ;;  %v1919_v12 = vmul.f32 %v1820_v31, %v772_v32 }
  0x70   :  { %v1287_v60 = vpop.eup %1286  ;;  %v1916_v18 = vmul.f32 0.6931472, %v1281_v41  ;;  %v822_v17 = vadd.f32 1.0, %v1855_v30  ;;  %v1923_v61 = vmul.f32 %v1825_v51, %v781_v40  ;;  %vm1925_vm6 = vcmp.lt.f32.partialorder %v783_v50, 0.0004427343 }
  0x71   :  { %v810_v4 = vand.u32 2147483647, %v1840_v24  ;;  %1300 = vlog2.f32 %v813_v45  ;;  %v831_v9 = vadd.f32 1.0, %v1863_v22  ;;  %v1289_v23 = vpop.eup %1288  ;;  %v1932_v41 = vmul.f32 %v1830_v3, %v790_v39 }
  0x72   :  { %vm1934_vm7 = vcmp.lt.f32.partialorder %v792_v48, 0.0004427343  ;;  %v816_v32 = vmul.f32 -0.5, %v1848_v54  ;;  %v840_v40 = vadd.f32 1.0, %v1875_v59  ;;  %v1291_v51 = vpop.eup %1290  ;;  %v731_v50 = vsel %vm1857_vm0, %v1843_v62, %v1906_v63 }
  0x73   :  { %v1944_v45 = vmul.f32 0.6931472, %v1287_v60  ;;  %v1947_v7 = vmul.f32 %v1835_v20, %v799_v5  ;;  %vm1949_vm8 = vcmp.lt.f32.partialorder %v801_v43, 0.0004427343  ;;  %v808_v39 = vadd.f32 1.0, %v807_v19 }
  0x74   :  { %v740_v48 = vsel %vm1865_vm1, %v1851_v56, %v1914_v27  ;;  %v749_v62 = vsel %vm1869_vm2, %v1881_v15, %v1916_v18  ;;  %1302 = vlog2.f32 %v822_v17  ;;  %v849_v28 = vadd.f32 1.0, %v1894_v35  ;;  %v1293_v20 = vpop.eup %1292 }
  0x75   :  { %v1962_v63 = vmul.f32 0.6931472, %v1289_v23  ;;  %vm1964_vm9 = vcmp.lt.f32.partialorder %v810_v4, 0.0004427343  ;;  %v825_v43 = vmul.f32 -0.5, %v1855_v30  ;;  %1304 = vlog2.f32 %v831_v9  ;;  %v1295_v37 = vpop.eup %1294 }
  0x76   :  { %v1969_v27 = vmul.f32 0.6931472, %v1291_v51  ;;  %v817_v56 = vadd.f32 1.0, %v816_v32  ;;  %1306 = vlog2.f32 %v840_v40  ;;  %v858_v58 = vadd.f32 1.0, %v1904_v47  ;;  %v1297_v15 = vpop.eup %1296 }
  0x77   :  { %v758_v23 = vsel %vm1888_vm3, %v1886_v49, %v1944_v45  ;;  %v1977_v19 = vmul.f32 %v1840_v24, %v808_v39  ;;  %v819_v60 = vand.u32 2147483647, %v1848_v54  ;;  %v834_v18 = vmul.f32 -0.5, %v1863_v22 }
  0x78   :  { %v1299_v17 = vpop.eup %1298  ;;  %v779_v4 = vmul.f32 0.6931472, %v1293_v20  ;;  %v828_v9 = vand.u32 2147483647, %v1855_v30  ;;  %v843_v32 = vmul.f32 -0.5, %v1875_v59  ;;  %1308 = vlog2.f32 %v849_v28 }
  0x79   :  { %v767_v55 = vsel %vm1899_vm4, %v1897_v36, %v1962_v63  ;;  %v788_v49 = vmul.f32 0.6931472, %v1295_v37  ;;  %v826_v40 = vadd.f32 1.0, %v825_v43  ;;  %1310 = vlog2.f32 %v858_v58 }
  0x7a   :  { %v776_v24 = vsel %vm1908_vm5, %v1919_v12, %v1969_v27  ;;  %v797_v51 = vmul.f32 0.6931472, %v1297_v15  ;;  %v1992_v45 = vmul.f32 %v1848_v54, %v817_v56  ;;  %v837_v39 = vand.u32 2147483647, %v1863_v22 }
  0x7b   :  { %v1301_v28 = vpop.eup %1300  ;;  %v806_v20 = vmul.f32 0.6931472, %v1299_v17  ;;  %vm1995_vm10 = vcmp.lt.f32.partialorder %v819_v60, 0.0004427343  ;;  %v835_v36 = vadd.f32 1.0, %v834_v18  ;;  %v852_v11 = vmul.f32 -0.5, %v1894_v35 }
  0x7c   :  { %v785_v57 = vsel %vm1925_vm6, %v1923_v61, %v779_v4  ;;  %vm2003_vm11 = vcmp.lt.f32.partialorder %v828_v9, 0.0004427343  ;;  %v844_v54 = vadd.f32 1.0, %v843_v32  ;;  %v861_v63 = vmul.f32 -0.5, %v1904_v47 }
  0x7d   :  { %v794_v43 = vsel %vm1934_vm7, %v1932_v41, %v788_v49  ;;  %v827_v37 = vmul.f32 %v1855_v30, %v826_v40  ;;  %v846_v27 = vand.u32 2147483647, %v1875_v59  ;;  %v855_v56 = vand.u32 2147483647, %v1894_v35 }
  0x7e   :  { %v1303_v58 = vpop.eup %1302  ;;  %v803_v26 = vsel %vm1949_vm8, %v1947_v7, %v797_v51  ;;  %v815_v61 = vmul.f32 0.6931472, %v1301_v28  ;;  %vm2017_vm12 = vcmp.lt.f32.partialorder %v837_v39, 0.0004427343  ;;  %v2993_v60 = vmax.f32 %v1717_v0, 0.0 }
  0x7f   :  { %v1305_v41 = vpop.eup %1304  ;;  %v812_v30 = vsel %vm1964_vm9, %v1977_v19, %v806_v20  ;;  %v836_v18 = vmul.f32 %v1863_v22, %v835_v36  ;;  %v853_v17 = vadd.f32 1.0, %v852_v11  ;;  %v2994_v3 = vmax.f32 %v1719_v1, 0.0 }
  0x80   :  { %v2023_v31 = vadd.f32 %v731_v50, %v2993_v60  ;;  %v1307_v4 = vpop.eup %1306  ;;  %v845_v9 = vmul.f32 %v1875_v59, %v844_v54  ;;  %v862_v32 = vadd.f32 1.0, %v861_v63  ;;  %v864_v0 = vand.u32 2147483647, %v1904_v47 }
  0x81   :  { %v2031_v7 = vadd.f32 %v740_v48, %v2994_v3  ;;  %v2995_v50 = vmax.f32 %v1721_v2, 0.0  ;;  %vm1124_vm13 = vcmp.lt.s32.totalorder %v1733_v13, 16  ;;  %v824_v5 = vmul.f32 0.6931472, %v1303_v58 }
  0x82   :  { %vm2040_vm14 = vcmp.lt.f32.partialorder %v846_v27, 0.0004427343  ;;  %vm2044_vm15 = vcmp.lt.f32.partialorder %v855_v56, 0.0004427343  ;;  %v3000_v59 = vmax.f32 %v1725_v6, 0.0  ;;  %v1309_v19 = vpop.eup %1308  ;;  %v821_v2 = vsel %vm1995_vm10, %v1992_v45, %v815_v61 }
  0x83   :  { %v2037_v49 = vadd.f32 %v749_v62, %v2995_v50  ;;  %v833_v62 = vmul.f32 0.6931472, %v1305_v41  ;;  %v3001_v40 = vmax.f32 %v1728_v8, 0.0  ;;  %v915_v39 = vmax.f32 %v2023_v31, 1e-12  ;;  %v1311_v28 = vpop.eup %1310 }
  0x84   :  { %v2050_v48 = vadd.f32 %v758_v23, %v3000_v59  ;;  %v842_v20 = vmul.f32 0.6931472, %v1307_v4  ;;  %v854_v36 = vmul.f32 %v1894_v35, %v853_v17  ;;  %v3002_v6 = vmax.f32 %v1730_v10, 0.0  ;;  %v914_v17 = vld [vmem:[#allocation7 + $0x78] sm:$0xff] }
  0x85   :  { %v2057_v51 = vadd.f32 %v767_v55, %v3001_v40  ;;  %v916_v11 = vmax.f32 %v2031_v7, 1e-12  ;;  %v863_v53 = vmul.f32 %v1904_v47, %v862_v32  ;;  %vm2067_vm0 = vcmp.lt.f32.partialorder %v864_v0, 0.0004427343 }
  0x86   :  { %v2063_v23 = vadd.f32 %v776_v24, %v3002_v6  ;;  %v3005_v8 = vmax.f32 %v1735_v14, 0.0  ;;  %v917_v54 = vmax.f32 %v2037_v49, 1e-12  ;;  %v830_v35 = vsel %vm2003_vm11, %v827_v37, %v824_v5 }
  0x87   :  { %v851_v10 = vmul.f32 0.6931472, %v1309_v19  ;;  %v3006_v24 = vmax.f32 %v1737_v16, 0.0  ;;  %v918_v47 = vmax.f32 %v2050_v48, 1e-12  ;;  %v839_v27 = vsel %vm2017_vm12, %v836_v18, %v833_v62  ;;  %v913_v18 = vld [vmem:[#allocation7 + $0x70] sm:$0xff] }
  0x88   :  { %v2073_v55 = vadd.f32 %v785_v57, %v3005_v8  ;;  %v860_v56 = vmul.f32 0.6931472, %v1311_v28  ;;  %v919_v14 = vmax.f32 %v2057_v51, 1e-12  ;;  %1312 = vlog2.f32 %v915_v39 }
  0x89   :  { %v2080_v63 = vadd.f32 %v794_v43, %v3006_v24  ;;  %v848_v57 = vsel %vm2040_vm14, %v845_v9, %v842_v20  ;;  %v3007_v12 = vmax.f32 %v1743_v21, 0.0  ;;  %v920_v16 = vmax.f32 %v2063_v23, 1e-12 }
  0x8a   :  { %1314 = vlog2.f32 %v916_v11  ;;  %v3008_v43 = vmax.f32 %v1747_v25, 0.0  ;;  %v3009_v61 = vmax.f32 %v1750_v29, 0.0  ;;  %v3010_v60 = vmax.f32 %v1754_v33, 0.0 }
  0x8b   :  { %v2090_v37 = vadd.f32 %v803_v26, %v3007_v12  ;;  %1316 = vlog2.f32 %v917_v54  ;;  %v857_v21 = vsel %vm2044_vm15, %v854_v36, %v851_v10  ;;  %v3011_v26 = vmax.f32 %v1756_v34, 0.0 }
  0x8c   :  { %v2095_v58 = vadd.f32 %v812_v30, %v3008_v43  ;;  %v2099_v15 = vadd.f32 %v821_v2, %v3009_v61  ;;  %v2103_v41 = vadd.f32 %v830_v35, %v3010_v60  ;;  %v921_v25 = vmax.f32 %v2073_v55, 1e-12 }
  0x8d   :  { %v2109_v3 = vadd.f32 %v839_v27, %v3011_v26  ;;  %1318 = vlog2.f32 %v918_v47  ;;  %v866_v29 = vsel %vm2067_vm0, %v863_v53, %v860_v56  ;;  %v3012_v33 = vmax.f32 %v1760_v38, 0.0 }
  0x8e   :  { %v922_v4 = vmax.f32 %v2080_v63, 1e-12  ;;  %1320 = vlog2.f32 %v919_v14  ;;  %v2119_v9 = vmul.f32 %v913_v18, %v913_v18  ;;  %v2121_v32 = vmul.f32 %v914_v17, %v914_v17 }
  0x8f   :  { %v2116_v30 = vadd.f32 %v848_v57, %v3012_v33  ;;  %1322 = vlog2.f32 %v920_v16  ;;  %v2950_v34 = vmov 0.0   ;;  %v3014_v50 = vmax.f32 %v1764_v42, 0.0 }
  0x90   :  { %v2126_v0 = vsel %vm1124_vm13, 1.0, %v2950_v34  ;;  %v923_v38 = vmax.f32 %v2090_v37, 1e-12  ;;  %v924_v22 = vmax.f32 %v2095_v58, 1e-12  ;;  %v3015_v59 = vmax.f32 %v1767_v46, 0.0 }
  0x91   :  { %3013 = vst [vmem:[#allocation28_spill] sm:$0xff] %v2126_v0  ;;  %v2130_v5 = vadd.f32 %v857_v21, %v3014_v50  ;;  %v925_v1 = vmax.f32 %v2099_v15, 1e-12  ;;  %v926_v2 = vmax.f32 %v2103_v41, 1e-12  ;;  %1324 = vlog2.f32 %v921_v25  ;;  %v3016_v21 = vld [vmem:[#allocation16_spill] sm:$0xff] }
  0x92   :  { %v2137_v19 = vadd.f32 %v866_v29, %v3015_v59  ;;  %v927_v62 = vmax.f32 %v2109_v3, 1e-12  ;;  %v928_v40 = vmax.f32 %v2116_v30, 1e-12  ;;  %1326 = vlog2.f32 %v922_v4  ;;  %v1313_v6 = vpop.eup %1312  ;;  %v3017_v29 = vld [vmem:[#allocation17_spill] sm:$0xff]  ;;  %v3018_v4 = vld [vmem:[#allocation18_spill] sm:$0xff] }
  0x93   :  { %v979_v42 = vmul.f32 %v2023_v31, %v2023_v31  ;;  %v980_v39 = vmul.f32 %v2031_v7, %v2031_v7  ;;  %v981_v28 = vmul.f32 %v2037_v49, %v2037_v49  ;;  %v982_v46 = vmul.f32 %v2050_v48, %v2050_v48  ;;  %v3020_v34 = vld [vmem:[#allocation20_spill] sm:$0xff] }
  0x94   :  { %v983_v20 = vmul.f32 %v2057_v51, %v2057_v51  ;;  %v984_v36 = vmul.f32 %v2063_v23, %v2063_v23  ;;  %v929_v11 = vmax.f32 %v2130_v5, 1e-12  ;;  %1328 = vlog2.f32 %v923_v38  ;;  %v1315_v8 = vpop.eup %1314  ;;  %v3019_v38 = vld [vmem:[#allocation19_spill] sm:$0xff] }
  0x95   :  { %v985_v53 = vmul.f32 %v2073_v55, %v2073_v55  ;;  %v986_v45 = vmul.f32 %v2080_v63, %v2080_v63  ;;  %v930_v54 = vmax.f32 %v2137_v19, 1e-12  ;;  %1330 = vlog2.f32 %v924_v22  ;;  %v1317_v24 = vpop.eup %1316 }
  0x96   :  { %v987_v35 = vmul.f32 %v2090_v37, %v2090_v37  ;;  %v988_v10 = vmul.f32 %v2095_v58, %v2095_v58  ;;  %v989_v47 = vmul.f32 %v2099_v15, %v2099_v15  ;;  %v990_v27 = vmul.f32 %v2103_v41, %v2103_v41 }
  0x97   :  { %v991_v56 = vmul.f32 %v2109_v3, %v2109_v3  ;;  %v2172_v14 = vmul.f32 %v2116_v30, %v2116_v30  ;;  %v1319_v57 = vpop.eup %1318  ;;  %v932_v12 = vmul.f32 0.6931472, %v1313_v6  ;;  %v2176_v16 = vmul.f32 %v2130_v5, %v2130_v5 }
  0x98   :  { %v2180_v43 = vmul.f32 %v2137_v19, %v2137_v19  ;;  %v1011_v61 = vadd.f32 %v1787_v44, %v979_v42  ;;  %v1321_v60 = vpop.eup %1320  ;;  %v934_v18 = vmul.f32 0.6931472, %v1315_v8  ;;  %1332 = vlog2.f32 %v925_v1 }
  0x99   :  { %v1012_v17 = vadd.f32 %v1791_v52, %v980_v39  ;;  %v1013_v26 = vadd.f32 %v3016_v21, %v981_v28  ;;  %v1323_v25 = vpop.eup %1322  ;;  %1334 = vlog2.f32 %v926_v2  ;;  %v1014_v33 = vadd.f32 %v3017_v29, %v982_v46  ;;  %v3021_v52 = vld [vmem:[#allocation21_spill] sm:$0xff] }
  0x9a   :  { %v1015_v50 = vadd.f32 %v3018_v4, %v983_v20  ;;  %v1016_v22 = vadd.f32 %v3019_v38, %v984_v36  ;;  %v936_v59 = vmul.f32 0.6931472, %v1317_v24  ;;  %v938_v6 = vmul.f32 0.6931472, %v1319_v57  ;;  %v3022_v20 = vld [vmem:[#allocation22_spill] sm:$0xff]  ;;  %v3023_v36 = vld [vmem:[#allocation23_spill] sm:$0xff] }
  0x9b   :  { %1336 = vlog2.f32 %v927_v62  ;;  %v1017_v44 = vadd.f32 %v3020_v34, %v985_v53  ;;  %v1325_v42 = vpop.eup %1324  ;;  %v940_v8 = vmul.f32 0.6931472, %v1321_v60  ;;  %v963_v1 = vsub.f32 0.0, %v932_v12  ;;  %v3024_v57 = vld [vmem:[#allocation24_spill] sm:$0xff] }
  0x9c   :  { %1338 = vlog2.f32 %v928_v40  ;;  %v1018_v39 = vadd.f32 %v3021_v52, %v986_v45  ;;  %v1327_v28 = vpop.eup %1326  ;;  %v942_v21 = vmul.f32 0.6931472, %v1323_v25  ;;  %v964_v2 = vsub.f32 0.0, %v934_v18 }
  0x9d   :  { %v1027_v13 = vmul.f32 0.5, %v1011_v61  ;;  %v1028_v46 = vmul.f32 0.5, %v1012_v17  ;;  %1340 = vlog2.f32 %v929_v11  ;;  %v1019_v29 = vadd.f32 %v3022_v20, %v987_v35  ;;  %v3026_v20 = vld [vmem:[#allocation26_spill] sm:$0xff] }
  0x9e   :  { %v1020_v24 = vadd.f32 %v3023_v36, %v988_v10  ;;  %v2193_v62 = vadd.f32 %v3024_v57, %v989_v47  ;;  %v1329_v34 = vpop.eup %1328  ;;  %v944_v53 = vmul.f32 0.6931472, %v1325_v42  ;;  %v965_v60 = vsub.f32 0.0, %v936_v59  ;;  %v3025_v10 = vld [vmem:[#allocation25_spill] sm:$0xff] }
  0x9f   :  { %v966_v40 = vsub.f32 0.0, %v938_v6  ;;  %v1029_v12 = vmul.f32 0.5, %v1013_v26  ;;  %v1331_v4 = vpop.eup %1330  ;;  %v946_v45 = vmul.f32 0.6931472, %v1327_v28  ;;  %v967_v38 = vsub.f32 0.0, %v940_v8 }
  0xa0   :  { %v1030_v25 = vmul.f32 0.5, %v1014_v33  ;;  %v1031_v18 = vmul.f32 0.5, %v1015_v50  ;;  %v968_v61 = vsub.f32 0.0, %v942_v21  ;;  %v1032_v17 = vmul.f32 0.5, %v1016_v22 }
  0xa1   :  { %v1043_v11 = vadd.f32 %v1027_v13, %v963_v1  ;;  %v1044_v52 = vadd.f32 %v1028_v46, %v964_v2  ;;  %v2195_v35 = vmul.f32 0.6931472, %v1329_v34  ;;  %1342 = vlog2.f32 %v930_v54  ;;  %v3027_v54 = vld [vmem:[#allocation27_spill] sm:$0xff] }
  0xa2   :  { %v2198_v47 = vadd.f32 %v3025_v10, %v990_v27  ;;  %v2201_v42 = vadd.f32 %v3026_v20, %v991_v56  ;;  %v1333_v59 = vpop.eup %1332  ;;  %v2203_v26 = vmul.f32 0.6931472, %v1331_v4  ;;  %v969_v6 = vsub.f32 0.0, %v944_v53 }
  0xa3   :  { %v1033_v8 = vmul.f32 0.5, %v1017_v44  ;;  %v1045_v33 = vadd.f32 %v1029_v12, %v965_v60  ;;  %v1335_v50 = vpop.eup %1334  ;;  %v970_v28 = vsub.f32 0.0, %v946_v45  ;;  %v1034_v22 = vmul.f32 0.5, %v1018_v39 }
  0xa4   :  { %v1046_v13 = vadd.f32 %v1030_v25, %v966_v40  ;;  %v1047_v1 = vadd.f32 %v1031_v18, %v967_v38  ;;  %v2207_v2 = vadd.f32 %v3027_v54, %v2172_v14  ;;  %v1048_v27 = vadd.f32 %v1032_v17, %v968_v61 }
  0xa5   :  { %v1337_v21 = vpop.eup %1336  ;;  %v1214_v46 = vadd.f32 -0.5, %v1043_v11  ;;  %v1215_v56 = vadd.f32 -0.5, %v1044_v52  ;;  %v2209_v57 = vmul.f32 0.6931472, %v1333_v59  ;;  %v971_v34 = vsub.f32 0.0, %v2195_v35 }
  0xa6   :  { %v1339_v36 = vpop.eup %1338  ;;  %v2214_v44 = vadd.f32 %v2119_v9, %v2176_v16  ;;  %v1035_v39 = vmul.f32 0.5, %v1019_v29  ;;  %v2216_v53 = vmul.f32 0.6931472, %v1335_v50  ;;  %v972_v60 = vsub.f32 0.0, %v2203_v26 }
  0xa7   :  { %v1036_v40 = vmul.f32 0.5, %v1020_v24  ;;  %v1216_v14 = vadd.f32 -0.5, %v1045_v33  ;;  %v1341_v12 = vpop.eup %1340  ;;  %v1049_v4 = vadd.f32 %v1033_v8, %v969_v6  ;;  %v1050_v45 = vadd.f32 %v1034_v22, %v970_v28  ;;  %v2305_v33 = vld [vmem:[#allocation5] sm:$0xff] }
  0xa8   :  { %v1217_v38 = vadd.f32 -0.5, %v1046_v13  ;;  %v1218_v25 = vadd.f32 -0.5, %v1047_v1  ;;  %v1219_v18 = vadd.f32 -0.5, %v1048_v27  ;;  %v1075_v61 = vadd.f32 %v1215_v56, %v1214_v46  ;;  %v2310_v1 = vld [vmem:[#allocation5 + $0x8] sm:$0xff]  ;;  %v2312_v56 = vld [vmem:[#allocation5 + $0x10] sm:$0xff] }
  0xa9   :  { %v1127_v17 = vmul.f32 %v2126_v0, %v2023_v31  ;;  %v1128_v9 = vmul.f32 %v2126_v0, %v2031_v7  ;;  %v1129_v16 = vmul.f32 %v2126_v0, %v2037_v49  ;;  %v1130_v29 = vmul.f32 %v2126_v0, %v2050_v48 }
  0xaa   :  { %v1131_v24 = vmul.f32 %v2126_v0, %v2057_v51  ;;  %v1132_v11 = vmul.f32 %v2126_v0, %v2063_v23  ;;  %v1076_v52 = vadd.f32 %v1216_v14, %v1075_v61  ;;  %v1133_v35 = vmul.f32 %v2126_v0, %v2073_v55 }
  0xab   :  { %v1134_v31 = vmul.f32 %v2126_v0, %v2080_v63  ;;  %v1135_v7 = vmul.f32 %v2126_v0, %v2090_v37  ;;  %1143 = vst [vmem:[%s2947_s10] sm:$0xff] %v1127_v17  ;;  %1144 = vst [vmem:[%s2947_s10 + $0x8] sm:$0xff] %v1128_v9  ;;  %v1343_v49 = vpop.eup %1342  ;;  %v1136_v48 = vmul.f32 %v2126_v0, %v2095_v58  ;;  %v958_v10 = vmul.f32 0.6931472, %v1339_v36 }
  0xac   :  { %v1137_v51 = vmul.f32 %v2126_v0, %v2099_v15  ;;  %v1138_v23 = vmul.f32 %v2126_v0, %v2103_v41  ;;  %v1139_v55 = vmul.f32 %v2126_v0, %v2109_v3  ;;  %1145 = vst [vmem:[%s2947_s10 + $0x10] sm:$0xff] %v1129_v16  ;;  %1146 = vst [vmem:[%s2947_s10 + $0x18] sm:$0xff] %v1130_v29  ;;  %v956_v41 = vmul.f32 0.6931472, %v1337_v21  ;;  %v2325_v16 = vld [vmem:[#allocation5 + $0x28] sm:$0xff] }
  0xad   :  { %1147 = vst [vmem:[%s2947_s10 + $0x20] sm:$0xff] %v1131_v24  ;;  %1148 = vst [vmem:[%s2947_s10 + $0x28] sm:$0xff] %v1132_v11  ;;  %v1077_v63 = vadd.f32 %v1217_v38, %v1076_v52  ;;  %v1140_v37 = vmul.f32 %v2126_v0, %v2116_v30  ;;  %v1141_v58 = vmul.f32 %v2126_v0, %v2130_v5  ;;  %v1037_v30 = vmul.f32 0.5, %v2193_v62 }
  0xae   :  { %v1142_v15 = vmul.f32 %v2126_v0, %v2137_v19  ;;  %1149 = vst [vmem:[%s2947_s10 + $0x30] sm:$0xff] %v1133_v35  ;;  %1150 = vst [vmem:[%s2947_s10 + $0x38] sm:$0xff] %v1134_v31  ;;  %v1026_v3 = vadd.f32 %v2121_v32, %v2180_v43  ;;  %v1038_v5 = vmul.f32 0.5, %v2198_v47  ;;  %v973_v32 = vsub.f32 0.0, %v2209_v57 }
  0xaf   :  { %1151 = vst [vmem:[%s2947_s10 + $0x40] sm:$0xff] %v1135_v7  ;;  %1152 = vst [vmem:[%s2947_s10 + $0x48] sm:$0xff] %v1136_v48  ;;  %v1051_v19 = vadd.f32 %v1035_v39, %v971_v34  ;;  %v1220_v43 = vadd.f32 -0.5, %v1049_v4  ;;  %v1078_v62 = vadd.f32 %v1218_v25, %v1077_v63  ;;  %v960_v47 = vmul.f32 0.6931472, %v1341_v12  ;;  %v2328_v7 = vld [vmem:[#allocation5 + $0x30] sm:$0xff] }
  0xb0   :  { %1153 = vst [vmem:[%s2947_s10 + $0x50] sm:$0xff] %v1137_v51  ;;  %1154 = vst [vmem:[%s2947_s10 + $0x58] sm:$0xff] %v1138_v23  ;;  %v962_v20 = vmul.f32 0.6931472, %v1343_v49  ;;  %v974_v59 = vsub.f32 0.0, %v2216_v53  ;;  %v1052_v26 = vadd.f32 %v1036_v40, %v972_v60  ;;  %v1221_v6 = vadd.f32 -0.5, %v1050_v45 }
  0xb1   :  { %1155 = vst [vmem:[%s2947_s10 + $0x60] sm:$0xff] %v1139_v55  ;;  %1156 = vst [vmem:[%s2947_s10 + $0x68] sm:$0xff] %v1140_v37  ;;  %v1079_v8 = vadd.f32 %v1219_v18, %v1078_v62  ;;  %v1039_v50 = vmul.f32 0.5, %v2201_v42  ;;  %v1040_v28 = vmul.f32 0.5, %v2207_v2  ;;  %v1041_v22 = vmul.f32 0.5, %v2214_v44  ;;  %v2315_v2 = vld [vmem:[#allocation5 + $0x18] sm:$0xff] }
  0xb2   :  { %1157 = vst [vmem:[%s2947_s10 + $0x70] sm:$0xff] %v1141_v58  ;;  %1158 = vst [vmem:[%s2947_s10 + $0x78] sm:$0xff] %v1142_v15  ;;  %v1042_v13 = vmul.f32 0.5, %v1026_v3  ;;  %v975_v21 = vsub.f32 0.0, %v956_v41  ;;  %v1053_v54 = vadd.f32 %v1037_v30, %v973_v32  ;;  %v1222_v27 = vadd.f32 -0.5, %v1051_v19  ;;  %v2322_v18 = vld [vmem:[#allocation5 + $0x20] sm:$0xff] }
  0xb3   :  { %v1080_v46 = vadd.f32 %v1220_v43, %v1079_v8  ;;  %v976_v36 = vsub.f32 0.0, %v958_v10  ;;  %v977_v57 = vsub.f32 0.0, %v960_v47  ;;  %v978_v34 = vsub.f32 0.0, %v962_v20  ;;  %v2333_v37 = vld [vmem:[#allocation5 + $0x38] sm:$0xff]  ;;  %v2335_v58 = vld [vmem:[#allocation5 + $0x40] sm:$0xff]  ;;  %v2341_v10 = vld [vmem:[#allocation5 + $0x50] sm:$0xff] }
  0xb4   :  { %v122_v39 = vand.u32 2147483647, %v2305_v33  ;;  %v1054_v53 = vadd.f32 %v1038_v5, %v974_v59  ;;  %v1223_v42 = vadd.f32 -0.5, %v1052_v26  ;;  %v123_v44 = vand.u32 2147483647, %v2310_v1  ;;  %v2339_v5 = vld [vmem:[#allocation5 + $0x48] sm:$0xff] }
  0xb5   :  { %v1081_v60 = vadd.f32 %v1221_v6, %v1080_v46  ;;  %v124_v4 = vand.u32 2147483647, %v2312_v56  ;;  %v1055_v45 = vadd.f32 %v1039_v50, %v975_v21  ;;  %v1224_v38 = vadd.f32 -0.5, %v1053_v54  ;;  %v2350_v54 = vld [vmem:[#allocation5 + $0x60] sm:$0xff] }
  0xb6   :  { %v1056_v17 = vadd.f32 %v1040_v28, %v976_v36  ;;  %v1057_v9 = vadd.f32 %v1041_v22, %v977_v57  ;;  %v125_v29 = vand.u32 2147483647, %v2315_v2  ;;  %v138_v24 = vsub.f32 0.0, %v122_v39  ;;  %v2346_v28 = vld [vmem:[#allocation5 + $0x58] sm:$0xff]  ;;  %v2356_v39 = vld [vmem:[#allocation5 + $0x70] sm:$0xff] }
  0xb7   :  { %v1082_v25 = vadd.f32 %v1222_v27, %v1081_v60  ;;  %v1058_v11 = vadd.f32 %v1042_v13, %v978_v34  ;;  %v1225_v52 = vadd.f32 -0.5, %v1054_v53  ;;  %v139_v31 = vsub.f32 0.0, %v123_v44  ;;  %v2354_v34 = vld [vmem:[#allocation5 + $0x68] sm:$0xff]  ;;  %v2359_v60 = vld [vmem:[#allocation5 + $0x78] sm:$0xff] }
  0xb8   :  { %v126_v51 = vand.u32 2147483647, %v2322_v18  ;;  %v140_v23 = vsub.f32 0.0, %v124_v4  ;;  %v1226_v55 = vadd.f32 -0.5, %v1055_v45  ;;  %v127_v41 = vand.u32 2147483647, %v2325_v16 }
  0xb9   :  { %v1083_v35 = vadd.f32 %v1223_v42, %v1082_v25  ;;  %v1227_v3 = vadd.f32 -0.5, %v1056_v17  ;;  %v1228_v30 = vadd.f32 -0.5, %v1057_v9  ;;  %v141_v32 = vsub.f32 0.0, %v125_v29 }
  0xba   :  { %v154_v19 = vmul.f32 1.442695, %v138_v24  ;;  %v1229_v43 = vadd.f32 -0.5, %v1058_v11  ;;  %v128_v47 = vand.u32 2147483647, %v2328_v7  ;;  %v142_v6 = vsub.f32 0.0, %v126_v51 }
  0xbb   :  { %v1084_v63 = vadd.f32 %v1224_v38, %v1083_v35  ;;  %v156_v20 = vmul.f32 1.442695, %v139_v31  ;;  %v129_v26 = vand.u32 2147483647, %v2333_v37  ;;  %v158_v8 = vmul.f32 1.442695, %v140_v23 }
  0xbc   :  { %v130_v13 = vand.u32 2147483647, %v2335_v58  ;;  %v143_v21 = vsub.f32 0.0, %v127_v41  ;;  %v131_v46 = vand.u32 2147483647, %v2339_v5  ;;  %1344 = vpow2.f32 %v154_v19 }
  0xbd   :  { %v1085_v62 = vadd.f32 %v1225_v52, %v1084_v63  ;;  %v160_v36 = vmul.f32 1.442695, %v141_v32  ;;  %v132_v53 = vand.u32 2147483647, %v2341_v10  ;;  %v144_v42 = vsub.f32 0.0, %v128_v47  ;;  %v362_v32 = vld [vmem:[#allocation2] sm:$0xff] }
  0xbe   :  { %1346 = vpow2.f32 %v156_v20  ;;  %v133_v44 = vand.u32 2147483647, %v2346_v28  ;;  %v145_v4 = vsub.f32 0.0, %v129_v26  ;;  %v162_v45 = vmul.f32 1.442695, %v142_v6  ;;  %v363_v20 = vld [vmem:[#allocation2 + $0x8] sm:$0xff] }
  0xbf   :  { %v1086_v50 = vadd.f32 %v1226_v55, %v1085_v62  ;;  %1348 = vpow2.f32 %v158_v8  ;;  %v134_v25 = vand.u32 2147483647, %v2350_v54  ;;  %v146_v17 = vsub.f32 0.0, %v130_v13 }
  0xc0   :  { %v164_v9 = vmul.f32 1.442695, %v143_v21  ;;  %v135_v29 = vand.u32 2147483647, %v2354_v34  ;;  %v136_v24 = vand.u32 2147483647, %v2356_v39  ;;  %1350 = vpow2.f32 %v160_v36 }
  0xc1   :  { %v1087_v57 = vadd.f32 %v1227_v3, %v1086_v50  ;;  %v147_v11 = vsub.f32 0.0, %v131_v46  ;;  %v137_v35 = vand.u32 2147483647, %v2359_v60  ;;  %v148_v31 = vsub.f32 0.0, %v132_v53  ;;  %v364_v50 = vld [vmem:[#allocation2 + $0x10] sm:$0xff] }
  0xc2   :  { %v166_v51 = vmul.f32 1.442695, %v144_v42  ;;  %v149_v55 = vsub.f32 0.0, %v133_v44  ;;  %1352 = vpow2.f32 %v162_v45  ;;  %v168_v63 = vmul.f32 1.442695, %v145_v4  ;;  %v366_v44 = vld [vmem:[#allocation2 + $0x20] sm:$0xff] }
  0xc3   :  { %v1088_v38 = vadd.f32 %v1228_v30, %v1087_v57  ;;  %v150_v3 = vsub.f32 0.0, %v134_v25  ;;  %1354 = vpow2.f32 %v164_v9  ;;  %v170_v30 = vmul.f32 1.442695, %v146_v17  ;;  %v365_v57 = vld [vmem:[#allocation2 + $0x18] sm:$0xff]  ;;  %v367_v9 = vld [vmem:[#allocation2 + $0x28] sm:$0xff] }
  0xc4   :  { %v151_v62 = vsub.f32 0.0, %v135_v29  ;;  %v172_v47 = vmul.f32 1.442695, %v147_v11  ;;  %v153_v6 = vsub.f32 0.0, %v137_v35  ;;  %1356 = vpow2.f32 %v166_v51  ;;  %v369_v35 = vld [vmem:[#allocation2 + $0x38] sm:$0xff] }
  0xc5   :  { %v1089_v52 = vadd.f32 %v1229_v43, %v1088_v38  ;;  %v152_v43 = vsub.f32 0.0, %v136_v24  ;;  %v174_v8 = vmul.f32 1.442695, %v148_v31  ;;  %1358 = vpow2.f32 %v168_v63  ;;  %v370_v31 = vld [vmem:[#allocation2 + $0x40] sm:$0xff] }
  0xc6   :  { %v2370_v13 = vpop.eup %1344  ;;  %v176_v36 = vmul.f32 1.442695, %v149_v55  ;;  %1360 = vpow2.f32 %v170_v30  ;;  %v178_v42 = vmul.f32 1.442695, %v150_v3  ;;  %v2376_v4 = vmul.f32 %v362_v32, %v362_v32  ;;  %v371_v30 = vld [vmem:[#allocation2 + $0x48] sm:$0xff]  ;;  %v372_v32 = vld [vmem:[#allocation2 + $0x50] sm:$0xff] }
  0xc7   :  { %1090 = vadd.xlane.f32.xlu1 %v1089_v52  ;;  %v2378_v45 = vmul.f32 %v363_v20, %v363_v20  ;;  %1362 = vpow2.f32 %v172_v47  ;;  %v180_v25 = vmul.f32 1.442695, %v151_v62  ;;  %v182_v17 = vmul.f32 1.442695, %v152_v43  ;;  %v368_v52 = vld [vmem:[#allocation2 + $0x30] sm:$0xff]  ;;  %v373_v20 = vld [vmem:[#allocation2 + $0x58] sm:$0xff] }
  0xc8   :  { %v2374_v53 = vpop.eup %1346  ;;  %v2382_v29 = vmul.f32 %v364_v50, %v364_v50  ;;  %1364 = vpow2.f32 %v174_v8  ;;  %v184_v24 = vmul.f32 1.442695, %v153_v6  ;;  %v186_v11 = vadd.f32 1.0, %v2370_v13 }
  0xc9   :  { %v2380_v38 = vpop.eup %1348  ;;  %v2385_v51 = vmul.f32 %v365_v57, %v365_v57  ;;  %1366 = vpow2.f32 %v176_v36  ;;  %v189_v63 = vmul.f32 -0.5, %v2370_v13  ;;  %v195_v3 = vadd.f32 1.0, %v2374_v53 }
  0xca   :  { %v2387_v55 = vpop.eup %1350  ;;  %v2391_v62 = vmul.f32 %v366_v44, %v366_v44  ;;  %1368 = vpow2.f32 %v178_v42  ;;  %v198_v43 = vmul.f32 -0.5, %v2374_v53  ;;  %v204_v47 = vadd.f32 1.0, %v2380_v38 }
  0xcb   :  { %v2395_v6 = vmul.f32 %v367_v9, %v367_v9  ;;  %1370 = vpow2.f32 %v180_v25  ;;  %v2399_v50 = vmul.f32 %v368_v52, %v368_v52  ;;  %v2401_v36 = vmul.f32 %v369_v35, %v369_v35  ;;  %v374_v25 = vld [vmem:[#allocation2 + $0x60] sm:$0xff]  ;;  %v375_v52 = vld [vmem:[#allocation2 + $0x68] sm:$0xff] }
  0xcc   :  { %3028 = vst [vmem:[#allocation16_spill] sm:$0xff] %v2391_v62  ;;  %v2397_v8 = vpop.eup %1352  ;;  %v2403_v57 = vmul.f32 %v370_v31, %v370_v31  ;;  %1372 = vlog2.f32 %v186_v11  ;;  %v213_v42 = vadd.f32 1.0, %v2387_v55  ;;  %v2408_v44 = vmul.f32 %v371_v30, %v371_v30 }
  0xcd   :  { %3029 = vst [vmem:[#allocation17_spill] sm:$0xff] %v2395_v6  ;;  %3030 = vst [vmem:[#allocation18_spill] sm:$0xff] %v2399_v50  ;;  %v2405_v46 = vpop.eup %1354  ;;  %v2410_v21 = vmul.f32 %v372_v32, %v372_v32  ;;  %v190_v9 = vadd.f32 1.0, %v189_v63  ;;  %v192_v26 = vand.u32 2147483647, %v2370_v13  ;;  %1374 = vlog2.f32 %v195_v3 }
  0xce   :  { %3031 = vst [vmem:[#allocation19_spill] sm:$0xff] %v2401_v36  ;;  %3032 = vst [vmem:[#allocation20_spill] sm:$0xff] %v2403_v57  ;;  %v2413_v19 = vmul.f32 %v373_v20, %v373_v20  ;;  %v2415_v35 = vpop.eup %1356  ;;  %v199_v31 = vadd.f32 1.0, %v198_v43  ;;  %1376 = vlog2.f32 %v204_v47  ;;  %v207_v11 = vmul.f32 -0.5, %v2380_v38 }
  0xcf   :  { %3033 = vst [vmem:[#allocation21_spill] sm:$0xff] %v2408_v44  ;;  %3034 = vst [vmem:[#allocation22_spill] sm:$0xff] %v2410_v21  ;;  %v222_v41 = vadd.f32 1.0, %v2397_v8  ;;  %v2419_v30 = vpop.eup %1358  ;;  %1378 = vpow2.f32 %v182_v17  ;;  %v201_v63 = vand.u32 2147483647, %v2374_v53  ;;  %v216_v32 = vmul.f32 -0.5, %v2387_v55 }
  0xd0   :  { %3035 = vst [vmem:[#allocation23_spill] sm:$0xff] %v2413_v19  ;;  %v231_v3 = vadd.f32 1.0, %v2405_v46  ;;  %v2424_v23 = vpop.eup %1360  ;;  %1380 = vlog2.f32 %v213_v42  ;;  %v225_v20 = vmul.f32 -0.5, %v2397_v8  ;;  %v2427_v43 = vmul.f32 %v374_v25, %v374_v25 }
  0xd1   :  { %v2429_v47 = vmul.f32 %v375_v52, %v375_v52  ;;  %v2431_v27 = vpop.eup %1362  ;;  %1382 = vpow2.f32 %v184_v24  ;;  %v2434_v17 = vmul.f32 %v2370_v13, %v190_v9  ;;  %v210_v22 = vand.u32 2147483647, %v2380_v38 }
  0xd2   :  { %3036 = vst [vmem:[#allocation24_spill] sm:$0xff] %v2427_v43  ;;  %v240_v59 = vadd.f32 1.0, %v2415_v35  ;;  %v2438_v15 = vpop.eup %1364  ;;  %v2441_v42 = vmul.f32 %v2374_v53, %v199_v31  ;;  %v208_v48 = vadd.f32 1.0, %v207_v11  ;;  %v219_v25 = vand.u32 2147483647, %v2387_v55 }
  0xd3   :  { %3037 = vst [vmem:[#allocation25_spill] sm:$0xff] %v2429_v47  ;;  %1384 = vlog2.f32 %v222_v41  ;;  %v2444_v52 = vpop.eup %1366  ;;  %vm2446_vm1 = vcmp.lt.f32.partialorder %v192_v26, 0.0004427343  ;;  %vm2450_vm2 = vcmp.lt.f32.partialorder %v201_v63, 0.0004427343  ;;  %v217_v9 = vadd.f32 1.0, %v216_v32 }
  0xd4   :  { %1386 = vlog2.f32 %v231_v3  ;;  %v234_v49 = vmul.f32 -0.5, %v2405_v46  ;;  %v249_v53 = vadd.f32 1.0, %v2419_v30  ;;  %v2456_v31 = vpop.eup %1368  ;;  %v226_v11 = vadd.f32 1.0, %v225_v20 }
  0xd5   :  { %v228_v41 = vand.u32 2147483647, %v2397_v8  ;;  %v243_v26 = vmul.f32 -0.5, %v2415_v35  ;;  %v258_v61 = vadd.f32 1.0, %v2424_v23  ;;  %v2461_v12 = vpop.eup %1370  ;;  %v237_v63 = vand.u32 2147483647, %v2405_v46 }
  0xd6   :  { %1388 = vlog2.f32 %v240_v59  ;;  %v252_v32 = vmul.f32 -0.5, %v2419_v30  ;;  %v267_v3 = vadd.f32 1.0, %v2431_v27  ;;  %v1373_v14 = vpop.eup %1372  ;;  %v2467_v40 = vmul.f32 %v2380_v38, %v208_v48 }
  0xd7   :  { %vm2469_vm3 = vcmp.lt.f32.partialorder %v210_v22, 0.0004427343  ;;  %vm2473_vm4 = vcmp.lt.f32.partialorder %v219_v25, 0.0004427343  ;;  %v261_v47 = vmul.f32 -0.5, %v2424_v23  ;;  %v1375_v43 = vpop.eup %1374  ;;  %v2479_v59 = vmul.f32 %v2387_v55, %v217_v9 }
  0xd8   :  { %v235_v19 = vadd.f32 1.0, %v234_v49  ;;  %1390 = vlog2.f32 %v249_v53  ;;  %v276_v21 = vadd.f32 1.0, %v2438_v15  ;;  %v1377_v48 = vpop.eup %1376  ;;  %v2483_v22 = vmul.f32 %v2397_v8, %v226_v11 }
  0xd9   :  { %vm2485_vm5 = vcmp.lt.f32.partialorder %v228_v41, 0.0004427343  ;;  %v244_v25 = vadd.f32 1.0, %v243_v26  ;;  %v246_v44 = vand.u32 2147483647, %v2415_v35  ;;  %1392 = vlog2.f32 %v258_v61  ;;  %v2490_v57 = vpop.eup %1378 }
  0xda   :  { %vm2492_vm6 = vcmp.lt.f32.partialorder %v237_v63, 0.0004427343  ;;  %v253_v49 = vadd.f32 1.0, %v252_v32  ;;  %v255_v9 = vand.u32 2147483647, %v2419_v30  ;;  %1394 = vlog2.f32 %v267_v3  ;;  %v1381_v53 = vpop.eup %1380 }
  0xdb   :  { %v264_v8 = vand.u32 2147483647, %v2424_v23  ;;  %v2498_v11 = vmul.f32 0.6931472, %v1373_v14  ;;  %v2500_v41 = vmul.f32 0.6931472, %v1375_v43  ;;  %v2503_v36 = vpop.eup %1382  ;;  %v2508_v50 = vmul.f32 %v2405_v46, %v235_v19 }
  0xdc   :  { %v262_v26 = vadd.f32 1.0, %v261_v47  ;;  %v270_v61 = vmul.f32 -0.5, %v2431_v27  ;;  %v2505_v63 = vmul.f32 0.6931472, %v1377_v48  ;;  %1396 = vlog2.f32 %v276_v21 }
  0xdd   :  { %v285_v32 = vadd.f32 1.0, %v2444_v52  ;;  %v1385_v6 = vpop.eup %1384  ;;  %v2512_v3 = vmul.f32 %v2415_v35, %v244_v25  ;;  %vm2514_vm7 = vcmp.lt.f32.partialorder %v246_v44, 0.0004427343  ;;  %v273_v43 = vand.u32 2147483647, %v2431_v27 }
  0xde   :  { %v294_v47 = vadd.f32 1.0, %v2456_v31  ;;  %v1387_v48 = vpop.eup %1386  ;;  %v2520_v62 = vmul.f32 0.6931472, %v1381_v53  ;;  %v2523_v19 = vmul.f32 %v2419_v30, %v253_v49  ;;  %vm2525_vm8 = vcmp.lt.f32.partialorder %v255_v9, 0.0004427343 }
  0xdf   :  { %v279_v46 = vmul.f32 -0.5, %v2438_v15  ;;  %v303_v44 = vadd.f32 1.0, %v2461_v12  ;;  %v194_v35 = vsel %vm2446_vm1, %v2434_v17, %v2498_v11  ;;  %v203_v25 = vsel %vm2450_vm2, %v2441_v42, %v2500_v41 }
  0xe0   :  { %v2540_v30 = vmul.f32 %v2424_v23, %v262_v26  ;;  %vm2542_vm9 = vcmp.lt.f32.partialorder %v264_v8, 0.0004427343  ;;  %v271_v9 = vadd.f32 1.0, %v270_v61  ;;  %v1389_v53 = vpop.eup %1388  ;;  %v212_v24 = vsel %vm2469_vm3, %v2467_v40, %v2505_v63 }
  0xe1   :  { %v2550_v17 = vmul.f32 0.6931472, %v1385_v6  ;;  %1398 = vlog2.f32 %v285_v32  ;;  %v312_v13 = vadd.f32 1.0, %v2490_v57  ;;  %v2553_v42 = vmul.f32 0.6931472, %v1387_v48 }
  0xe2   :  { %vm2555_vm10 = vcmp.lt.f32.partialorder %v273_v43, 0.0004427343  ;;  %v288_v8 = vmul.f32 -0.5, %v2444_v52  ;;  %1400 = vlog2.f32 %v294_v47  ;;  %v1391_v11 = vpop.eup %1390  ;;  %v221_v40 = vsel %vm2473_vm4, %v2479_v59, %v2520_v62 }
  0xe3   :  { %v280_v6 = vadd.f32 1.0, %v279_v46  ;;  %1402 = vlog2.f32 %v303_v44  ;;  %v321_v20 = vadd.f32 1.0, %v2503_v36  ;;  %v1393_v41 = vpop.eup %1392  ;;  %v2565_v26 = vmul.f32 0.6931472, %v1389_v53 }
  0xe4   :  { %v282_v61 = vand.u32 2147483647, %v2438_v15  ;;  %v297_v63 = vmul.f32 -0.5, %v2456_v31  ;;  %1404 = vlog2.f32 %v312_v13  ;;  %v1395_v32 = vpop.eup %1394  ;;  %v230_v43 = vsel %vm2485_vm5, %v2483_v22, %v2550_v17 }
  0xe5   :  { %v2574_v0 = vmul.f32 %v2431_v27, %v271_v9  ;;  %v291_v62 = vand.u32 2147483647, %v2444_v52  ;;  %v306_v59 = vmul.f32 -0.5, %v2461_v12  ;;  %v239_v47 = vsel %vm2492_vm6, %v2508_v50, %v2553_v42 }
  0xe6   :  { %v251_v48 = vmul.f32 0.6931472, %v1391_v11  ;;  %v289_v46 = vadd.f32 1.0, %v288_v8  ;;  %1406 = vlog2.f32 %v321_v20  ;;  %v1397_v44 = vpop.eup %1396  ;;  %v260_v53 = vmul.f32 0.6931472, %v1393_v41 }
  0xe7   :  { %v2583_v38 = vmul.f32 %v2438_v15, %v280_v6  ;;  %v300_v27 = vand.u32 2147483647, %v2456_v31  ;;  %v315_v22 = vmul.f32 -0.5, %v2490_v57  ;;  %v248_v9 = vsel %vm2514_vm7, %v2512_v3, %v2565_v26 }
  0xe8   :  { %v269_v17 = vmul.f32 0.6931472, %v1395_v32  ;;  %vm2591_vm11 = vcmp.lt.f32.partialorder %v282_v61, 0.0004427343  ;;  %v298_v55 = vadd.f32 1.0, %v297_v63  ;;  %v307_v15 = vadd.f32 1.0, %v306_v59 }
  0xe9   :  { %vm2595_vm12 = vcmp.lt.f32.partialorder %v291_v62, 0.0004427343  ;;  %v309_v42 = vand.u32 2147483647, %v2461_v12  ;;  %v324_v8 = vmul.f32 -0.5, %v2503_v36  ;;  %v257_v14 = vsel %vm2525_vm8, %v2523_v19, %v251_v48 }
  0xea   :  { %v278_v3 = vmul.f32 0.6931472, %v1397_v44  ;;  %v290_v11 = vmul.f32 %v2444_v52, %v289_v46  ;;  %v318_v6 = vand.u32 2147483647, %v2490_v57  ;;  %v266_v41 = vsel %vm2542_vm9, %v2540_v30, %v260_v53 }
  0xeb   :  { %v1399_v20 = vpop.eup %1398  ;;  %vm2609_vm13 = vcmp.lt.f32.partialorder %v300_v27, 0.0004427343  ;;  %v316_v61 = vadd.f32 1.0, %v315_v22  ;;  %v3064_v63 = vmax.f32 %v2305_v33, 0.0  ;;  %v275_v52 = vsel %vm2555_vm10, %v2574_v0, %v269_v17  ;;  %v3069_v0 = vld [vmem:[#allocation15_spill] sm:$0xff] }
  0xec   :  { %v1401_v19 = vpop.eup %1400  ;;  %v299_v21 = vmul.f32 %v2456_v31, %v298_v55  ;;  %v327_v62 = vand.u32 2147483647, %v2503_v36  ;;  %v3065_v30 = vmax.f32 %v2310_v1, 0.0  ;;  %v308_v48 = vmul.f32 %v2461_v12, %v307_v15 }
  0xed   :  { %v2615_v32 = vadd.f32 %v194_v35, %v3064_v63  ;;  %v1403_v59 = vpop.eup %1402  ;;  %vm2627_vm14 = vcmp.lt.f32.partialorder %v309_v42, 0.0004427343  ;;  %v325_v35 = vadd.f32 1.0, %v324_v8  ;;  %v3068_v46 = vmax.f32 %v2312_v56, 0.0 }
  0xee   :  { %v2624_v49 = vadd.f32 %v203_v25, %v3065_v30  ;;  %vm590_vm15 = vcmp.lt.s32.totalorder %v3069_v0, 32  ;;  %v1405_v31 = vpop.eup %1404  ;;  %v284_v1 = vsel %vm2591_vm11, %v2583_v38, %v278_v3  ;;  %v287_v25 = vmul.f32 0.6931472, %v1399_v20 }
  0xef   :  { %v2633_v23 = vadd.f32 %v212_v24, %v3068_v46  ;;  %vm2639_vm0 = vcmp.lt.f32.partialorder %v318_v6, 0.0004427343  ;;  %v3072_v12 = vmax.f32 %v2315_v2, 0.0  ;;  %v296_v27 = vmul.f32 0.6931472, %v1401_v19 }
  0xf0   :  { %v317_v56 = vmul.f32 %v2490_v57, %v316_v61  ;;  %v3073_v24 = vmax.f32 %v2322_v18, 0.0  ;;  %v378_v17 = vmax.f32 %v2615_v32, 1e-12  ;;  %v1407_v50 = vpop.eup %1406  ;;  %v305_v38 = vmul.f32 0.6931472, %v1403_v59 }
  0xf1   :  { %v2645_v53 = vadd.f32 %v221_v40, %v3072_v12  ;;  %vm2653_vm1 = vcmp.lt.f32.partialorder %v327_v62, 0.0004427343  ;;  %v3076_v15 = vmax.f32 %v2325_v16, 0.0  ;;  %v379_v40 = vmax.f32 %v2624_v49, 1e-12 }
  0xf2   :  { %v2650_v22 = vadd.f32 %v230_v43, %v3073_v24  ;;  %v314_v42 = vmul.f32 0.6931472, %v1405_v31  ;;  %v326_v57 = vmul.f32 %v2503_v36, %v325_v35  ;;  %v3077_v18 = vmax.f32 %v2328_v7, 0.0 }
  0xf3   :  { %v2659_v2 = vadd.f32 %v239_v47, %v3076_v15  ;;  %v380_v8 = vmax.f32 %v2633_v23, 1e-12  ;;  %v293_v3 = vsel %vm2595_vm12, %v290_v11, %v287_v25  ;;  %v3078_v6 = vmax.f32 %v2333_v37, 0.0 }
  0xf4   :  { %v2665_v43 = vadd.f32 %v248_v9, %v3077_v18  ;;  %v3079_v16 = vmax.f32 %v2335_v58, 0.0  ;;  %v381_v61 = vmax.f32 %v2645_v53, 1e-12  ;;  %v302_v7 = vsel %vm2609_vm13, %v299_v21, %v296_v27  ;;  %v376_v9 = vld [vmem:[#allocation2 + $0x70] sm:$0xff] }
  0xf5   :  { %v2672_v20 = vadd.f32 %v257_v14, %v3078_v6  ;;  %v323_v36 = vmul.f32 0.6931472, %v1407_v50  ;;  %v382_v63 = vmax.f32 %v2650_v22, 1e-12  ;;  %1408 = vlog2.f32 %v378_v17 }
  0xf6   :  { %v2676_v47 = vadd.f32 %v266_v41, %v3079_v16  ;;  %v311_v13 = vsel %vm2627_vm14, %v308_v48, %v305_v38  ;;  %v3080_v37 = vmax.f32 %v2339_v5, 0.0  ;;  %v383_v58 = vmax.f32 %v2659_v2, 1e-12 }
  0xf7   :  { %1410 = vlog2.f32 %v379_v40  ;;  %v320_v11 = vsel %vm2639_vm0, %v317_v56, %v314_v42  ;;  %v3081_v41 = vmax.f32 %v2341_v10, 0.0  ;;  %v3082_v19 = vmax.f32 %v2346_v28, 0.0 }
  0xf8   :  { %v2686_v14 = vadd.f32 %v275_v52, %v3080_v37  ;;  %1412 = vlog2.f32 %v380_v8  ;;  %v3083_v62 = vmax.f32 %v2350_v54, 0.0  ;;  %v377_v52 = vld [vmem:[#allocation2 + $0x78] sm:$0xff]  ;;  %v384_v30 = vmax.f32 %v2665_v43, 1e-12 }
  0xf9   :  { %v2693_v26 = vadd.f32 %v284_v1, %v3081_v41  ;;  %v2697_v21 = vadd.f32 %v293_v3, %v3082_v19  ;;  %1414 = vlog2.f32 %v381_v61  ;;  %v2704_v59 = vmul.f32 %v376_v9, %v376_v9 }
  0xfa   :  { %v2701_v5 = vadd.f32 %v302_v7, %v3083_v62  ;;  %v329_v10 = vsel %vm2653_vm1, %v326_v57, %v323_v36  ;;  %v3084_v48 = vmax.f32 %v2354_v34, 0.0  ;;  %v385_v28 = vmax.f32 %v2672_v20, 1e-12 }
  0xfb   :  { %1416 = vlog2.f32 %v382_v63  ;;  %v3085_v54 = vmax.f32 %v2356_v39, 0.0  ;;  %v386_v46 = vmax.f32 %v2676_v47, 1e-12  ;;  %v3086_v31 = vmov 0.0  }
  0xfc   :  { %v2710_v33 = vadd.f32 %v311_v13, %v3084_v48  ;;  %1418 = vlog2.f32 %v383_v58  ;;  %v2721_v1 = vsel %vm590_vm15, 1.0, %v3086_v31  ;;  %v387_v25 = vmax.f32 %v2686_v14, 1e-12  ;;  %v3089_v48 = vld [vmem:[#allocation16_spill] sm:$0xff]  ;;  %v3091_v31 = vld [vmem:[#allocation18_spill] sm:$0xff] }
  0xfd   :  { %v2715_v35 = vadd.f32 %v320_v11, %v3085_v54  ;;  %v388_v34 = vmax.f32 %v2693_v26, 1e-12  ;;  %v389_v44 = vmax.f32 %v2697_v21, 1e-12  ;;  %v2726_v12 = vmul.f32 %v377_v52, %v377_v52  ;;  %v3090_v54 = vld [vmem:[#allocation17_spill] sm:$0xff] }
  0xfe   :  { %v3088_v39 = vmax.f32 %v2359_v60, 0.0  ;;  %v390_v56 = vmax.f32 %v2701_v5, 1e-12  ;;  %1420 = vlog2.f32 %v384_v30  ;;  %v442_v0 = vmul.f32 %v2615_v32, %v2615_v32 }
  0xff   :  { %3087 = vst [vmem:[#allocation26_spill] sm:$0xff] %v2726_v12  ;;  %v391_v24 = vmax.f32 %v2710_v33, 1e-12  ;;  %1422 = vlog2.f32 %v385_v28  ;;  %v443_v17 = vmul.f32 %v2624_v49, %v2624_v49  ;;  %v444_v50 = vmul.f32 %v2633_v23, %v2633_v23  ;;  %v1409_v40 = vpop.eup %1408 }
 0x100   :  { %v2730_v27 = vadd.f32 %v329_v10, %v3088_v39  ;;  %v392_v38 = vmax.f32 %v2715_v35, 1e-12  ;;  %v445_v60 = vmul.f32 %v2645_v53, %v2645_v53  ;;  %v446_v55 = vmul.f32 %v2650_v22, %v2650_v22 }
 0x101   :  { %v447_v15 = vmul.f32 %v2659_v2, %v2659_v2  ;;  %1424 = vlog2.f32 %v386_v46  ;;  %v448_v42 = vmul.f32 %v2665_v43, %v2665_v43  ;;  %v449_v57 = vmul.f32 %v2672_v20, %v2672_v20  ;;  %v1411_v8 = vpop.eup %1410 }
 0x102   :  { %v450_v18 = vmul.f32 %v2676_v47, %v2676_v47  ;;  %v393_v3 = vmax.f32 %v2730_v27, 1e-12  ;;  %1426 = vlog2.f32 %v387_v25  ;;  %v451_v6 = vmul.f32 %v2686_v14, %v2686_v14  ;;  %v1413_v61 = vpop.eup %1412 }
 0x103   :  { %v452_v16 = vmul.f32 %v2693_v26, %v2693_v26  ;;  %v453_v7 = vmul.f32 %v2697_v21, %v2697_v21  ;;  %v454_v36 = vmul.f32 %v2701_v5, %v2701_v5  ;;  %v455_v9 = vmul.f32 %v2710_v33, %v2710_v33  ;;  %v1415_v13 = vpop.eup %1414 }
 0x104   :  { %v2766_v63 = vmul.f32 %v2715_v35, %v2715_v35  ;;  %v395_v37 = vmul.f32 0.6931472, %v1409_v40  ;;  %v2770_v58 = vmul.f32 %v2730_v27, %v2730_v27  ;;  %v474_v11 = vadd.f32 %v2376_v4, %v442_v0  ;;  %v3092_v4 = vld [vmem:[#allocation19_spill] sm:$0xff] }
 0x105   :  { %v475_v41 = vadd.f32 %v2378_v45, %v443_v17  ;;  %v1417_v19 = vpop.eup %1416  ;;  %v397_v62 = vmul.f32 0.6931472, %v1411_v8  ;;  %1428 = vlog2.f32 %v388_v34  ;;  %v476_v52 = vadd.f32 %v2382_v29, %v444_v50  ;;  %v3093_v29 = vld [vmem:[#allocation20_spill] sm:$0xff] }
 0x106   :  { %v477_v30 = vadd.f32 %v2385_v51, %v445_v60  ;;  %v1419_v10 = vpop.eup %1418  ;;  %1430 = vlog2.f32 %v389_v44  ;;  %v478_v28 = vadd.f32 %v3089_v48, %v446_v55  ;;  %v479_v46 = vadd.f32 %v3090_v54, %v447_v15  ;;  %v3094_v15 = vld [vmem:[#allocation21_spill] sm:$0xff] }
 0x107   :  { %v480_v25 = vadd.f32 %v3091_v31, %v448_v42  ;;  %v399_v39 = vmul.f32 0.6931472, %v1413_v61  ;;  %v401_v40 = vmul.f32 0.6931472, %v1415_v13  ;;  %1432 = vlog2.f32 %v390_v56  ;;  %v3095_v42 = vld [vmem:[#allocation22_spill] sm:$0xff]  ;;  %v3096_v13 = vld [vmem:[#allocation23_spill] sm:$0xff] }
 0x108   :  { %v481_v45 = vadd.f32 %v3092_v4, %v449_v57  ;;  %v1421_v0 = vpop.eup %1420  ;;  %v403_v17 = vmul.f32 0.6931472, %v1417_v19  ;;  %1434 = vlog2.f32 %v391_v24  ;;  %v426_v34 = vsub.f32 0.0, %v395_v37 }
 0x109   :  { %v482_v50 = vadd.f32 %v3093_v29, %v450_v18  ;;  %v1423_v51 = vpop.eup %1422  ;;  %v405_v60 = vmul.f32 0.6931472, %v1419_v10  ;;  %v427_v44 = vsub.f32 0.0, %v397_v62  ;;  %v490_v8 = vmul.f32 0.5, %v474_v11 }
 0x10a   :  { %v491_v55 = vmul.f32 0.5, %v475_v41  ;;  %1436 = vlog2.f32 %v392_v38  ;;  %v483_v48 = vadd.f32 %v3094_v15, %v451_v6  ;;  %v484_v61 = vadd.f32 %v3095_v42, %v452_v16  ;;  %v3097_v6 = vld [vmem:[#allocation24_spill] sm:$0xff] }
 0x10b   :  { %v485_v56 = vadd.f32 %v3096_v13, %v453_v7  ;;  %v1425_v54 = vpop.eup %1424  ;;  %v407_v57 = vmul.f32 0.6931472, %v1421_v0  ;;  %v428_v31 = vsub.f32 0.0, %v399_v39  ;;  %v429_v19 = vsub.f32 0.0, %v401_v40  ;;  %v3098_v7 = vld [vmem:[#allocation25_spill] sm:$0xff] }
 0x10c   :  { %v492_v24 = vmul.f32 0.5, %v476_v52  ;;  %v1427_v37 = vpop.eup %1426  ;;  %v409_v4 = vmul.f32 0.6931472, %v1423_v51  ;;  %v430_v18 = vsub.f32 0.0, %v403_v17  ;;  %v493_v29 = vmul.f32 0.5, %v477_v30 }
 0x10d   :  { %v494_v10 = vmul.f32 0.5, %v478_v28  ;;  %v431_v62 = vsub.f32 0.0, %v405_v60  ;;  %v495_v11 = vmul.f32 0.5, %v479_v46  ;;  %v506_v41 = vadd.f32 %v490_v8, %v426_v34 }
 0x10e   :  { %v507_v38 = vadd.f32 %v491_v55, %v427_v44  ;;  %v2784_v12 = vmul.f32 0.6931472, %v1425_v54  ;;  %1438 = vlog2.f32 %v393_v3  ;;  %v2787_v16 = vadd.f32 %v3097_v6, %v454_v36 }
 0x10f   :  { %v2790_v0 = vadd.f32 %v3098_v7, %v455_v9  ;;  %v1429_v39 = vpop.eup %1428  ;;  %v2792_v52 = vmul.f32 0.6931472, %v1427_v37  ;;  %v432_v40 = vsub.f32 0.0, %v407_v57  ;;  %v496_v17 = vmul.f32 0.5, %v480_v25 }
 0x110   :  { %v508_v30 = vadd.f32 %v492_v24, %v428_v31  ;;  %v1431_v28 = vpop.eup %1430  ;;  %v433_v51 = vsub.f32 0.0, %v409_v4  ;;  %v497_v46 = vmul.f32 0.5, %v481_v45  ;;  %v509_v34 = vadd.f32 %v493_v29, %v429_v19 }
 0x111   :  { %v510_v60 = vadd.f32 %v494_v10, %v430_v18  ;;  %v1433_v44 = vpop.eup %1432  ;;  %v498_v8 = vmul.f32 0.5, %v482_v50  ;;  %v511_v3 = vadd.f32 %v495_v11, %v431_v62  ;;  %v1196_v55 = vadd.f32 -0.5, %v506_v41 }
 0x112   :  { %v1197_v36 = vadd.f32 -0.5, %v507_v38  ;;  %v1435_v15 = vpop.eup %1434  ;;  %v2794_v42 = vmul.f32 0.6931472, %v1429_v39  ;;  %v434_v9 = vsub.f32 0.0, %v2784_v12  ;;  %v2797_v13 = vmul.f32 0.5, %v483_v48 }
 0x113   :  { %v2799_v54 = vmul.f32 0.5, %v484_v61  ;;  %v2801_v25 = vmul.f32 0.6931472, %v1431_v28  ;;  %v435_v45 = vsub.f32 0.0, %v2792_v52  ;;  %v2804_v57 = vmul.f32 0.5, %v485_v56 }
 0x114   :  { %v1198_v31 = vadd.f32 -0.5, %v508_v30  ;;  %v1437_v50 = vpop.eup %1436  ;;  %v512_v19 = vadd.f32 %v496_v17, %v432_v40  ;;  %v513_v24 = vadd.f32 %v497_v46, %v433_v51  ;;  %v1199_v37 = vadd.f32 -0.5, %v509_v34 }
 0x115   :  { %v1200_v4 = vadd.f32 -0.5, %v510_v60  ;;  %v1201_v18 = vadd.f32 -0.5, %v511_v3  ;;  %v538_v29 = vadd.f32 %v1197_v36, %v1196_v55  ;;  %v593_v12 = vmul.f32 %v2721_v1, %v2615_v32  ;;  %v3099_v60 = vld [vmem:[#allocation26_spill] sm:$0xff] }
 0x116   :  { %v594_v48 = vmul.f32 %v2721_v1, %v2624_v49  ;;  %v595_v61 = vmul.f32 %v2721_v1, %v2633_v23  ;;  %v596_v56 = vmul.f32 %v2721_v1, %v2645_v53  ;;  %v597_v10 = vmul.f32 %v2721_v1, %v2650_v22  ;;  %v2833_v23 = vld [vmem:[%s2944_s7] sm:$0x1] }
 0x117   :  { %v598_v62 = vmul.f32 %v2721_v1, %v2659_v2  ;;  %v539_v11 = vadd.f32 %v1198_v31, %v538_v29  ;;  %v599_v41 = vmul.f32 %v2721_v1, %v2665_v43  ;;  %v600_v32 = vmul.f32 %v2721_v1, %v2672_v20  ;;  %609 = vst [vmem:[%s2945_s8] sm:$0xff] %v593_v12  ;;  %v2838_v53 = vld [vmem:[%s2940_s3] sm:$0x1] }
 0x118   :  { %v601_v49 = vmul.f32 %v2721_v1, %v2676_v47  ;;  %610 = vst [vmem:[%s2945_s8 + $0x8] sm:$0xff] %v594_v48  ;;  %v1439_v22 = vpop.eup %1438  ;;  %v602_v2 = vmul.f32 %v2721_v1, %v2686_v14  ;;  %v603_v43 = vmul.f32 %v2721_v1, %v2693_v26  ;;  %v604_v20 = vmul.f32 %v2721_v1, %v2697_v21 }
 0x119   :  { %v605_v47 = vmul.f32 %v2721_v1, %v2701_v5  ;;  %611 = vst [vmem:[%s2945_s8 + $0x10] sm:$0xff] %v595_v61  ;;  %612 = vst [vmem:[%s2945_s8 + $0x18] sm:$0xff] %v596_v56  ;;  %v540_v14 = vadd.f32 %v1199_v37, %v539_v11  ;;  %v606_v26 = vmul.f32 %v2721_v1, %v2710_v33  ;;  %v419_v38 = vmul.f32 0.6931472, %v1433_v44 }
 0x11a   :  { %613 = vst [vmem:[%s2945_s8 + $0x20] sm:$0xff] %v597_v10  ;;  %614 = vst [vmem:[%s2945_s8 + $0x28] sm:$0xff] %v598_v62  ;;  %v607_v21 = vmul.f32 %v2721_v1, %v2715_v35  ;;  %v608_v5 = vmul.f32 %v2721_v1, %v2730_v27  ;;  %v488_v33 = vadd.f32 %v2704_v59, %v2766_v63  ;;  %v885_v35 = vand.u32 2147483647, %v2833_v23 }
 0x11b   :  { %615 = vst [vmem:[%s2945_s8 + $0x30] sm:$0xff] %v599_v41  ;;  %616 = vst [vmem:[%s2945_s8 + $0x38] sm:$0xff] %v600_v32  ;;  %v348_v59 = vand.u32 2147483647, %v2838_v53  ;;  %v436_v27 = vsub.f32 0.0, %v2794_v42  ;;  %v514_v63 = vadd.f32 %v498_v8, %v434_v9  ;;  %v1202_v6 = vadd.f32 -0.5, %v512_v19 }
 0x11c   :  { %617 = vst [vmem:[%s2945_s8 + $0x40] sm:$0xff] %v601_v49  ;;  %618 = vst [vmem:[%s2945_s8 + $0x48] sm:$0xff] %v602_v2  ;;  %v541_v7 = vadd.f32 %v1200_v4, %v540_v14  ;;  %v421_v39 = vmul.f32 0.6931472, %v1435_v15  ;;  %v502_v52 = vmul.f32 0.5, %v2787_v16  ;;  %v886_v40 = vsub.f32 0.0, %v885_v35 }
 0x11d   :  { %619 = vst [vmem:[%s2945_s8 + $0x50] sm:$0xff] %v603_v43  ;;  %620 = vst [vmem:[%s2945_s8 + $0x58] sm:$0xff] %v604_v20  ;;  %v349_v17 = vsub.f32 0.0, %v348_v59  ;;  %v437_v30 = vsub.f32 0.0, %v2801_v25  ;;  %v515_v28 = vadd.f32 %v2797_v13, %v435_v45  ;;  %v1203_v51 = vadd.f32 -0.5, %v513_v24 }
 0x11e   :  { %621 = vst [vmem:[%s2945_s8 + $0x60] sm:$0xff] %v605_v47  ;;  %622 = vst [vmem:[%s2945_s8 + $0x68] sm:$0xff] %v606_v26  ;;  %v542_v46 = vadd.f32 %v1201_v18, %v541_v7  ;;  %v423_v34 = vmul.f32 0.6931472, %v1437_v50  ;;  %v489_v44 = vadd.f32 %v3099_v60, %v2770_v58  ;;  %v887_v8 = vmul.f32 1.442695, %v886_v40 }
 0x11f   :  { %623 = vst [vmem:[%s2945_s8 + $0x70] sm:$0xff] %v607_v21  ;;  %624 = vst [vmem:[%s2945_s8 + $0x78] sm:$0xff] %v608_v5  ;;  %v350_v3 = vmul.f32 1.442695, %v349_v17  ;;  %v438_v55 = vsub.f32 0.0, %v419_v38  ;;  %v516_v36 = vadd.f32 %v2799_v54, %v436_v27  ;;  %v1204_v15 = vadd.f32 -0.5, %v514_v63 }
 0x120   :  { %v543_v42 = vadd.f32 %v1202_v6, %v542_v46  ;;  %v425_v16 = vmul.f32 0.6931472, %v1439_v22  ;;  %v439_v9 = vsub.f32 0.0, %v421_v39  ;;  %v503_v31 = vmul.f32 0.5, %v2790_v0  ;;  %v3100_v46 = vld [vmem:[#allocation28_spill] sm:$0xff] }
 0x121   :  { %1440 = vpow2.f32 %v887_v8  ;;  %v517_v13 = vadd.f32 %v2804_v57, %v437_v30  ;;  %v1205_v25 = vadd.f32 -0.5, %v515_v28  ;;  %v504_v50 = vmul.f32 0.5, %v488_v33 }
 0x122   :  { %v544_v45 = vadd.f32 %v1203_v51, %v543_v42  ;;  %1442 = vpow2.f32 %v350_v3  ;;  %v440_v19 = vsub.f32 0.0, %v423_v34  ;;  %v518_v58 = vadd.f32 %v502_v52, %v438_v55 }
 0x123   :  { %v1206_v24 = vadd.f32 -0.5, %v516_v36  ;;  %v505_v4 = vmul.f32 0.5, %v489_v44  ;;  %v441_v18 = vsub.f32 0.0, %v425_v16  ;;  %v519_v54 = vadd.f32 %v503_v31, %v439_v9 }
 0x124   :  { %v545_v37 = vadd.f32 %v1204_v15, %v544_v45  ;;  %v1207_v29 = vadd.f32 -0.5, %v517_v13  ;;  %v520_v48 = vadd.f32 %v504_v50, %v440_v19  ;;  %v1208_v61 = vadd.f32 -0.5, %v518_v58 }
 0x125   :  { %v521_v0 = vadd.f32 %v505_v4, %v441_v18  ;;  %v1209_v10 = vadd.f32 -0.5, %v519_v54  ;;  %v884_v27 = vmax.f32 %v2833_v23, 0.0  ;;  %v347_v39 = vmax.f32 %v2838_v53, 0.0  ;;  %v1101_v23 = vld [vmem:[%s2943_s6] sm:$0x1] }
 0x126   :  { %v546_v12 = vadd.f32 %v1205_v25, %v545_v37  ;;  %v1210_v41 = vadd.f32 -0.5, %v520_v48  ;;  %v564_v53 = vld [vmem:[%s2939_s2] sm:$0x1]  ;;  %vm575_vm4 = vcmask 1040384   ;;  %vm1161_vm5 = vcmask 0  }
 0x127   :  { %v1211_v2 = vadd.f32 -0.5, %v521_v0  ;;  %v570_v55 = vmul.f32 %v564_v53, %v564_v53 }
 0x128   :  { %v547_v56 = vadd.f32 %v1206_v24, %v546_v12 }
 0x12a   :  { %v548_v62 = vadd.f32 %v1207_v29, %v547_v56 }
 0x12b   :  { %v1441_v57 = vpop.eup %1440 }
 0x12c   :  { %v1443_v11 = vpop.eup %1442  ;;  %v549_v32 = vadd.f32 %v1208_v61, %v548_v62  ;;  %v889_v49 = vadd.f32 1.0, %v1441_v57  ;;  %v892_v20 = vmul.f32 -0.5, %v1441_v57  ;;  %v895_v5 = vand.u32 2147483647, %v1441_v57 }
 0x12d   :  { %v352_v22 = vadd.f32 1.0, %v1443_v11  ;;  %v355_v14 = vmul.f32 -0.5, %v1443_v11  ;;  %v358_v33 = vand.u32 2147483647, %v1443_v11 }
 0x12e   :  { %v550_v43 = vadd.f32 %v1209_v10, %v549_v32  ;;  %1444 = vlog2.f32 %v889_v49  ;;  %v893_v21 = vadd.f32 1.0, %v892_v20  ;;  %vm896_vm2 = vcmp.lt.f32.partialorder %v895_v5, 0.0004427343 }
 0x12f   :  { %1446 = vlog2.f32 %v352_v22  ;;  %v356_v38 = vadd.f32 1.0, %v355_v14  ;;  %vm359_vm3 = vcmp.lt.f32.partialorder %v358_v33, 0.0004427343 }
 0x130   :  { %v551_v47 = vadd.f32 %v1210_v41, %v550_v43  ;;  %v894_v35 = vmul.f32 %v1441_v57, %v893_v21 }
 0x131   :  { %v357_v63 = vmul.f32 %v1443_v11, %v356_v38 }
 0x132   :  { %v552_v26 = vadd.f32 %v1211_v2, %v551_v47 }
 0x134   :  { %553 = vadd.xlane.f32.xlu0 %v552_v26 }
 0x138   :  { %v1445_v59 = vpop.eup %1444 }
 0x139   :  { %v1447_v6 = vpop.eup %1446  ;;  %v891_v7 = vmul.f32 0.6931472, %v1445_v59 }
 0x13a   :  { %v354_v52 = vmul.f32 0.6931472, %v1447_v6 }
 0x13b   :  { %v897_v40 = vsel %vm896_vm2, %v894_v35, %v891_v7 }
 0x13c   :  { %v898_v17 = vadd.f32 %v897_v40, %v884_v27  ;;  %v360_v30 = vsel %vm359_vm3, %v357_v63, %v354_v52 }
 0x13d   :  { %v361_v28 = vadd.f32 %v360_v30, %v347_v39 }
 0x13e   :  { %v1102_v51 = vmax.f32 %v898_v17, 1e-12  ;;  %v1159_v34 = vmul.f32 %v3100_v46, %v898_v17  ;;  %v1106_v8 = vmul.f32 %v898_v17, %v898_v17 }
 0x13f   :  { %v565_v60 = vmax.f32 %v361_v28, 1e-12  ;;  %v625_v44 = vmul.f32 %v2721_v1, %v361_v28  ;;  %v1107_v1 = vmul.f32 %v1101_v23, %v1101_v23  ;;  %v569_v3 = vmul.f32 %v361_v28, %v361_v28 }
 0x140   :  { %1448 = vlog2.f32 %v1102_v51  ;;  %1160 = vst [vmem:[%s2948_s11] sm:$0x1] %v1159_v34 }
 0x141   :  { %1450 = vlog2.f32 %v565_v60  ;;  %626 = vst [vmem:[%s2946_s9] sm:$0x1] %v625_v44  ;;  %v1108_v36 = vadd.f32 %v1107_v1, %v1106_v8  ;;  %v571_v15 = vadd.f32 %v570_v55, %v569_v3 }
 0x143   :  { %v1109_v31 = vmul.f32 0.5, %v1108_v36  ;;  %v572_v25 = vmul.f32 0.5, %v571_v15 }
 0x14a   :  { %v1449_v42 = vpop.eup %1448 }
 0x14b   :  { %v1451_v16 = vpop.eup %1450  ;;  %v1104_v9 = vmul.f32 0.6931472, %v1449_v42 }
 0x14c   :  { %v567_v13 = vmul.f32 0.6931472, %v1451_v16 }
 0x14d   :  { %v1105_v45 = vsub.f32 0.0, %v1104_v9 }
 0x14e   :  { %v568_v50 = vsub.f32 0.0, %v567_v13 }
 0x14f   :  { %v1110_v19 = vadd.f32 %v1109_v31, %v1105_v45 }
 0x150   :  { %v573_v58 = vadd.f32 %v572_v25, %v568_v50 }
 0x151   :  { %v1230_v24 = vadd.f32 -0.5, %v1110_v19 }
 0x152   :  { %v1212_v37 = vadd.f32 -0.5, %v573_v58 }
 0x153   :  { %v1112_v4 = vsel %vm575_vm4, %v1230_v24, 0.0 }
 0x154   :  { %1113 = vadd.xlane.f32.xlu1 %v1112_v4  ;;  %v576_v18 = vsel %vm575_vm4, %v1212_v37, 0.0  ;;  %v1091_v10 = vpop.xlane.xlu1 %1090 }
 0x155   :  { %577 = vadd.xlane.f32.xlu0 %v576_v18  ;;  %v1092_v62 = vrot.slane %v1091_v10, 4 }
 0x157   :  { %v1093_v57 = vadd.f32 %v1092_v62, %v1091_v10 }
 0x159   :  { %v1094_v41 = vrot.slane %v1093_v57, 2 }
 0x15b   :  { %v1095_v47 = vadd.f32 %v1094_v41, %v1093_v57 }
 0x15d   :  { %v1096_v5 = vrot.slane %v1095_v47, 1 }
 0x15f   :  { %v1097_v27 = vadd.f32 %v1096_v5, %v1095_v47 }
 0x1c1   :  { %v554_v54 = vpop.xlane.xlu0 %553 }
 0x1c2   :  { %v555_v29 = vrot.slane %v554_v54, 4 }
 0x1c4   :  { %v556_v12 = vadd.f32 %v555_v29, %v554_v54 }
 0x1c6   :  { %v557_v48 = vrot.slane %v556_v12, 2 }
 0x1c8   :  { %v558_v61 = vadd.f32 %v557_v48, %v556_v12 }
 0x1ca   :  { %v559_v56 = vrot.slane %v558_v61, 1 }
 0x1cc   :  { %v560_v0 = vadd.f32 %v559_v56, %v558_v61 }
 0x1ce   :  { %1232 = vpush %v560_v0 }
 0x1e1   :  { %v1114_v11 = vpop.xlane.xlu1 %1113 }
 0x1e2   :  { %v1115_v32 = vrot.slane %v1114_v11, 4  ;;  %v578_v49 = vpop.xlane.xlu0 %577 }
 0x1e3   :  { %v579_v22 = vrot.slane %v578_v49, 4 }
 0x1e4   :  { %v1116_v2 = vadd.f32 %v1115_v32, %v1114_v11 }
 0x1e5   :  { %v580_v43 = vadd.f32 %v579_v22, %v578_v49 }
 0x1e6   :  { %v1117_v20 = vrot.slane %v1116_v2, 2 }
 0x1e7   :  { %v581_v14 = vrot.slane %v580_v43, 2 }
 0x1e8   :  { %v1118_v26 = vadd.f32 %v1117_v20, %v1116_v2 }
 0x1e9   :  { %v582_v21 = vadd.f32 %v581_v14, %v580_v43 }
 0x1ea   :  { %v1119_v38 = vrot.slane %v1118_v26, 1 }
 0x1eb   :  { %v583_v33 = vrot.slane %v582_v21, 1 }
 0x1ec   :  { %v1120_v59 = vadd.f32 %v1119_v38, %v1118_v26 }
 0x1ed   :  { %v584_v35 = vadd.f32 %v583_v33, %v582_v21 }
 0x1ef   :  { %1234 = vpush %v584_v35 }
 0x1f0   :  { %1236 = vpush %v1097_v27 }
 0x1f1   :  { %1238 = vpush %v1120_v59 }
 0x1ff   :  { %s1233_s2 = spop %1232 }
 0x200   :  { %v562_v63 = vstv %s1233_s2 }
 0x220   :  { %s1235_s6 = spop %1234 }
 0x221   :  { %v586_v6 = vstv %s1235_s6  ;;  %s1237_s9 = spop %1236 }
 0x222   :  { %v587_v7 = vadd.f32 %v586_v6, %v562_v63  ;;  %s1239_s11 = spop %1238  ;;  %v1099_v39 = vstv %s1237_s9 }
 0x223   :  { %v1122_v40 = vstv %s1239_s11 }
 0x224   :  { %v1100_v52 = vadd.f32 %v1099_v39, %v587_v7 }
 0x226   :  { %v1123_v17 = vadd.f32 %v1122_v40, %v1100_v52 }
 0x228   :  { %1162 = vst.msk [vmem:[#allocation10] sm:$0x1] %vm1161_vm5, %v1123_v17 }
 0x229   :  { %1551 = shalt.err (!%p1548_p8)
}
 0x22a   :  { %s1552_s0 = scalar_lea.hbm %s2949_s12, 16 }
 0x22b   :  { %p1553_p9 = scmp.ne.s32.totalorder %s2949_s12, %s1552_s0  ;;  %p1556_p10 = scmp.lt.u32.totalorder %s1552_s0, %s2949_s12 }
 0x22d   :  { %p1558_p11 = pnand %p1556_p10, %p1553_p9 }
 0x22f   :  { %1561 = shalt.err (!%p1558_p11)
}
 0x230   :  { %1180 = dma.vmem_to_hbm [thread:$0]  %s1178_s19, 16, %s2949_s12, [#allocation4]  }
 0x231   :  { %1568 = dma.done.wait [#allocation4], 16  }
 0x232   :  { %1569 = vsyncadd [#allocation4], 4294967280 }
 0x233   :  { %1192 = vsyncpa [#allocation3], 1 }
 0x234   :  { %1193 = vsyncpa [#allocation6], 1 }
 0x235   :  { %1194 = vsyncpa [#allocation9], 1 }
 0x236   :  { %1195 = vsyncpa [#allocation4], 1 }

</bundles_post_ra>
